<compile_context>
chip_gen: v5e
topology: v5e:2x2
jax: 0.10.0
libtpu: 0.0.40
codegen_flags: <defaults>
</compile_context>

<pallas_src>
import jax
import jax.numpy as jnp
from jax import lax
from jax.experimental import pallas as pl
from jax.experimental.pallas import tpu as pltpu


# --------------------------- Pallas kernels ---------------------------------

def _order0_kernel(x0_ref, x1_ref, w1x0_ref, w1e_ref, w1f_ref, b1_ref, w2_ref, b2_ref, o_ref):
    """Order-0 branch: [x0 | reduce1(x1)] -> MLP -> (1, d0)   (one batch element)."""
    x0 = x0_ref[0]                                   # (1, C0)
    x1 = x1_ref[0]                                   # (N, C1)
    ex = jnp.max(x1, axis=0, keepdims=True)          # exists  (1, C1)
    fa = jnp.min(x1, axis=0, keepdims=True)          # forall  (1, C1)
    h = (jnp.dot(x0, w1x0_ref[...], preferred_element_type=jnp.float32)
         + jnp.dot(ex, w1e_ref[...], preferred_element_type=jnp.float32)
         + jnp.dot(fa, w1f_ref[...], preferred_element_type=jnp.float32)
         + b1_ref[...])
    h = jnp.maximum(h, 0.0)
    o_ref[0] = jnp.dot(h, w2_ref[...], preferred_element_type=jnp.float32) + b2_ref[...]


def _order1_kernel(x0_ref, x1_ref, x2_ref, w1x0_ref, w1x1_ref, w1e_ref, w1f_ref,
                   b1_ref, w2_ref, b2_ref, o_ref):
    """Order-1 branch: [expand(x0) | x1 | reduce2(x2)] -> MLP -> max over N -> (1, d1)."""
    x0 = x0_ref[0]                                   # (1, C0)
    x1 = x1_ref[0]                                   # (N, C1)
    x2 = x2_ref[0]                                   # (N, N, C2)
    n, _, c = x2.shape
    ii = lax.broadcasted_iota(jnp.int32, (n, n, c), 0)
    jj = lax.broadcasted_iota(jnp.int32, (n, n, c), 1)
    notself = ii != jj                               # exclude-self mask (i != j)
    ex = jnp.max(jnp.where(notself, x2, 0.0), axis=1)   # exists  (N, C2)
    fa = jnp.min(jnp.where(notself, x2, 1.0), axis=1)   # forall  (N, C2)
    h = (jnp.dot(x0, w1x0_ref[...], preferred_element_type=jnp.float32)   # (1, H) -> bcast
         + jnp.dot(x1, w1x1_ref[...], preferred_element_type=jnp.float32)
         + jnp.dot(ex, w1e_ref[...], preferred_element_type=jnp.float32)
         + jnp.dot(fa, w1f_ref[...], preferred_element_type=jnp.float32)
         + b1_ref[...])
    h = jnp.maximum(h, 0.0)
    logits = jnp.dot(h, w2_ref[...], preferred_element_type=jnp.float32) + b2_ref[...]  # (N, d1)
    # Reasoner: max over the object axis, fused here so (B,N,d1) never hits HBM.
    o_ref[0] = jnp.max(logits, axis=0, keepdims=True)


def _order2_kernel(x1_ref, x2_ref, e_ref, w1a_ref, w1b_ref, b1_ref, w2_ref, b2_ref, o_ref):
    """Order-2 branch: [expand(x1) | x2] -> MLP -> max over (N,N) -> (1, d2)."""
    x1 = x1_ref[0]                                   # (N, C1)
    x2 = x2_ref[0]                                   # (N*N, C2)  (flattened object pair axis)
    # expander contribution: row n1*N+n2 needs x1[n1] @ W1a; E is the (N*N, N) one-hot
    # replication matrix, so E @ (x1 @ W1a) broadcasts it without any in-kernel reshape.
    h_exp = jnp.dot(x1, w1a_ref[...], preferred_element_type=jnp.float32)       # (N, H)
    h = (jnp.dot(e_ref[...], h_exp, preferred_element_type=jnp.float32)         # (N*N, H)
         + jnp.dot(x2, w1b_ref[...], preferred_element_type=jnp.float32)
         + b1_ref[...])
    h = jnp.maximum(h, 0.0)
    logits = jnp.dot(h, w2_ref[...], preferred_element_type=jnp.float32) + b2_ref[...]  # (N*N, d2)
    # Reasoner: max over both object axes, fused (the (B,N,N,d2) tensor never hits HBM).
    o_ref[0] = jnp.max(logits, axis=0, keepdims=True)


def _planner_head_kernel(r_ref, m0_ref, m1_ref, o_ref):
    """Planner head: log_prob = cat([logsig(-r), logsig(r)], 1) @ Mat, with Mat row-split."""
    x = r_ref[...]

    def logsig(t):  # numerically stable log-sigmoid
        return jnp.minimum(t, 0.0) - jnp.log(1.0 + jnp.exp(-jnp.abs(t)))

    o_ref[...] = (jnp.dot(logsig(-x), m0_ref[...], preferred_element_type=jnp.float32)
                  + jnp.dot(logsig(x), m1_ref[...], preferred_element_type=jnp.float32))


# --------------------------- wrappers ----------------------------------------

def _const2(_b):
    return (0, 0)


def planner_forward(inputs, params, mat):
    """Fused Pallas forward for Planner with breadth=2.

    inputs: [x0 (B,C), x1 (B,N,C), x2 (B,N,N,C)]
    params: list of 3 (w1, b1, w2, b2) tuples (LogitsInference per order)
    mat:    (2*(d0+d1+d2), A)
    """
    # TODO(synk): general breadth>2 (order-k exclude-self reducers); Planner spec here uses breadth=2.
    x0, x1, x2 = inputs
    B, N, C1 = x1.shape
    C0 = x0.shape[-1]
    C2 = x2.shape[-1]
    H = params[0][0].shape[1]

    x0r = x0.reshape(B, 1, C0)            # keep last-two block dims == full array dims
    x2f = x2.reshape(B, N * N, C2)        # free row-major reshape; pair axis flattened

    par = pltpu.CompilerParams(dimension_semantics=("parallel",))

    # ---- order-0 branch ------------------------------------------------------
    w1, b1, w2, b2 = params[0]
    d0 = w2.shape[1]
    out0 = pl.pallas_call(
        _order0_kernel,
        out_shape=jax.ShapeDtypeStruct((B, 1, d0), jnp.float32),
        grid=(B,),
        in_specs=[
            pl.BlockSpec((1, 1, C0), lambda b: (b, 0, 0)),
            pl.BlockSpec((1, N, C1), lambda b: (b, 0, 0)),
            pl.BlockSpec((C0, H), _const2),
            pl.BlockSpec((C1, H), _const2),
            pl.BlockSpec((C1, H), _const2),
            pl.BlockSpec((1, H), _const2),
            pl.BlockSpec((H, d0), _const2),
            pl.BlockSpec((1, d0), _const2),
        ],
        out_specs=pl.BlockSpec((1, 1, d0), lambda b: (b, 0, 0)),
        compiler_params=par,
    )(x0r, x1,
      w1[:C0],            # x0 rows
      w1[C0::2],          # exists rows (interleave folded into weight-row split)
      w1[C0 + 1::2],      # forall rows
      b1.reshape(1, -1), w2, b2.reshape(1, -1))
    out0 = out0[:, 0, :]                                          # (B, d0)

    # ---- order-1 branch ------------------------------------------------------
    w1, b1, w2, b2 = params[1]
    d1 = w2.shape[1]
    out1 = pl.pallas_call(
        _order1_kernel,
        out_shape=jax.ShapeDtypeStruct((B, 1, d1), jnp.float32),
        grid=(B,),
        in_specs=[
            pl.BlockSpec((1, 1, C0), lambda b: (b, 0, 0)),
            pl.BlockSpec((1, N, C1), lambda b: (b, 0, 0)),
            pl.BlockSpec((1, N, N, C2), lambda b: (b, 0, 0, 0)),
            pl.BlockSpec((C0, H), _const2),
            pl.BlockSpec((C1, H), _const2),
            pl.BlockSpec((C2, H), _const2),
            pl.BlockSpec((C2, H), _const2),
            pl.BlockSpec((1, H), _const2),
            pl.BlockSpec((H, d1), _const2),
            pl.BlockSpec((1, d1), _const2),
        ],
        out_specs=pl.BlockSpec((1, 1, d1), lambda b: (b, 0, 0)),
        compiler_params=par,
    )(x0r, x1, x2,
      w1[:C0],                    # expand(x0) rows
      w1[C0:C0 + C1],             # x1 rows
      w1[C0 + C1::2],             # exists rows of reduce2(x2)
      w1[C0 + C1 + 1::2],         # forall rows of reduce2(x2)
      b1.reshape(1, -1), w2, b2.reshape(1, -1))
    out1 = out1[:, 0, :]                                          # (B, d1)

    # ---- order-2 branch (hot path) ------------------------------------------
    w1, b1, w2, b2 = params[2]
    d2 = w2.shape[1]
    # one-hot replication matrix: E[n1*N + n2, n1] = 1  (expander broadcast as a tiny matmul)
    expmat = jnp.repeat(jnp.eye(N, dtype=jnp.float32), N, axis=0)  # (N*N, N)
    out2 = pl.pallas_call(
        _order2_kernel,
        out_shape=jax.ShapeDtypeStruct((B, 1, d2), jnp.float32),
        grid=(B,),
        in_specs=[
            pl.BlockSpec((1, N, C1), lambda b: (b, 0, 0)),
            pl.BlockSpec((1, N * N, C2), lambda b: (b, 0, 0)),
            pl.BlockSpec((N * N, N), _const2),
            pl.BlockSpec((C1, H), _const2),
            pl.BlockSpec((C2, H), _const2),
            pl.BlockSpec((1, H), _const2),
            pl.BlockSpec((H, d2), _const2),
            pl.BlockSpec((1, d2), _const2),
        ],
        out_specs=pl.BlockSpec((1, 1, d2), lambda b: (b, 0, 0)),
        compiler_params=par,
    )(x1, x2f, expmat,
      w1[:C1],            # expand(x1) rows
      w1[C1:],            # x2 rows
      b1.reshape(1, -1), w2, b2.reshape(1, -1))
    out2 = out2[:, 0, :]                                          # (B, d2)

    # ---- Reasoner concat (tiny) + Planner head ------------------------------
    # NOTE: LogicLayer's mask_idx bookkeeping is skipped — Planner uses act_mask=False.
    r = jnp.concatenate([out0, out1, out2], axis=1)               # (B, d0+d1+d2)
    D = r.shape[1]
    log_prob = pl.pallas_call(
        _planner_head_kernel,
        out_shape=jax.ShapeDtypeStruct((B, mat.shape[1]), jnp.float32),
    )(r, mat[:D], mat[D:])
    return log_prob


planner_forward_jit = jax.jit(planner_forward)


# --------------------------- parameter init ----------------------------------

def init_planner_params(key, breadth, input_dim, output_dims, hidden_dim):
    """Mirror LogicLayer dimension bookkeeping: cur = expander + own + reducer channels."""
    params = []
    for i in range(breadth + 1):
        cur = input_dim
        if i > 0:
            cur += input_dim                 # Expander(i-1) output channels
        if i + 1 < breadth + 1:
            cur += 2 * input_dim             # Reducer(i+1): exists + forall
        key, k1, k2, k3, k4 = jax.random.split(key, 5)
        w1 = jax.random.normal(k1, (cur, hidden_dim), jnp.float32) / jnp.sqrt(cur)
        b1 = jax.random.normal(k2, (hidden_dim,), jnp.float32) * 0.01
        w2 = jax.random.normal(k3, (hidden_dim, output_dims[i]), jnp.float32) / jnp.sqrt(hidden_dim)
        b2 = jax.random.normal(k4, (output_dims[i],), jnp.float32) * 0.01
        params.append((w1, b1, w2, b2))
    return params


# --------------------------- pure-JAX reference ------------------------------

def reference_planner(inputs, params, mat):
    x0, x1, x2 = inputs
    B, N, _ = x1.shape

    def mlp(x, p):
        w1, b1, w2, b2 = p
        h = jnp.maximum(x @ w1 + b1, 0.0)
        return h @ w2 + b2

    def reduce1(x):                     # (B,N,C) -> (B,2C), interleaved [e0,f0,e1,f1,...]
        ex = jnp.max(x, axis=1)
        fa = jnp.min(x, axis=1)
        return jnp.stack([ex, fa], axis=-1).reshape(x.shape[0], -1)

    def reduce2(x):                     # (B,N,N,C) -> (B,N,2C), exclude-self, interleaved
        n = x.shape[1]
        m = (jnp.arange(n)[:, None] != jnp.arange(n)[None, :])[None, :, :, None]
        ex = jnp.max(jnp.where(m, x, 0.0), axis=2)
        fa = jnp.min(jnp.where(m, x, 1.0), axis=2)
        return jnp.stack([ex, fa], axis=-1).reshape(x.shape[0], n, -1)

    # LogicLayer
    f0 = jnp.concatenate([x0, reduce1(x1)], axis=-1)
    out0 = mlp(f0, params[0])                                                    # (B, d0)
    f1 = jnp.concatenate([jnp.broadcast_to(x0[:, None, :], (B, N, x0.shape[-1])),
                          x1, reduce2(x2)], axis=-1)
    out1 = mlp(f1, params[1])                                                    # (B, N, d1)
    f2 = jnp.concatenate([jnp.broadcast_to(x1[:, :, None, :], (B, N, N, x1.shape[-1])),
                          x2], axis=-1)
    out2 = mlp(f2, params[2])                                                    # (B, N, N, d2)
    # Reasoner (act_mask=False in Planner)
    r = jnp.concatenate([out0, jnp.max(out1, axis=1), jnp.max(out2, axis=(1, 2))], axis=1)
    # Planner head
    pol_prob = jnp.concatenate([jax.nn.log_sigmoid(-r), jax.nn.log_sigmoid(r)], axis=1)
    return pol_prob @ mat


# --------------------------- main ---------------------------------------------

if __name__ == "__main__":
    key = jax.random.PRNGKey(0)
    B, N = 2, 8
    breadth = 2                 # max_order
    input_dim = 4               # predicate channels per order
    hidden = 32                 # logic_hidden_dim
    n_actions = 8
    output_dims = [2 if r == 0 or r == breadth else 3 for r in range(breadth + 1)]  # [2,3,2]

    k0, k1, k2, kp, km = jax.random.split(key, 5)
    x0 = jax.random.uniform(k0, (B, input_dim), jnp.float32)
    x1 = jax.random.uniform(k1, (B, N, input_dim), jnp.float32)
    x2 = jax.random.uniform(k2, (B, N, N, input_dim), jnp.float32)
    inputs = [x0, x1, x2]

    params = init_planner_params(kp, breadth, input_dim, output_dims, hidden)
    mat = jax.random.normal(km, (2 * sum(output_dims), n_actions), jnp.float32)

    out = planner_forward_jit(inputs, params, mat)
    out = jax.block_until_ready(out)

    ref = reference_planner(inputs, params, mat)
    assert out.shape == (B, n_actions), out.shape
    assert jnp.allclose(out, ref, atol=2e-3, rtol=2e-3), float(jnp.max(jnp.abs(out - ref)))

    print("KERNEL_OK")
</pallas_src>

<mosaic_0001>
module attributes {stable_mosaic.version = 11 : i64} {
  func.func @_order0_kernel(%arg0: i32, %arg1: memref<1x1x4xf32, #tpu.memory_space<vmem>>, %arg2: memref<1x8x4xf32, #tpu.memory_space<vmem>>, %arg3: memref<4x32xf32, #tpu.memory_space<vmem>>, %arg4: memref<4x32xf32, #tpu.memory_space<vmem>>, %arg5: memref<4x32xf32, #tpu.memory_space<vmem>>, %arg6: memref<1x32xf32, #tpu.memory_space<vmem>>, %arg7: memref<32x2xf32, #tpu.memory_space<vmem>>, %arg8: memref<1x2xf32, #tpu.memory_space<vmem>>, %arg9: memref<1x1x2xf32, #tpu.memory_space<vmem>>) attributes {dimension_semantics = [#tpu.dimension_semantics<parallel>], iteration_bounds = array<i64: 2>, scalar_prefetch = 0 : i64, scratch_operands = 0 : i64, tpu.core_type = #tpu.core_type<tc>, window_params = [{transform_indices = @transform_0, window_bounds = array<i64: 1, 1, 4>}, {transform_indices = @transform_1, window_bounds = array<i64: 1, 8, 4>}, {pipeline_mode = #tpu.pipeline_mode<synchronous>, transform_indices = @transform_2, window_bounds = array<i64: 4, 32>}, {pipeline_mode = #tpu.pipeline_mode<synchronous>, transform_indices = @transform_3, window_bounds = array<i64: 4, 32>}, {pipeline_mode = #tpu.pipeline_mode<synchronous>, transform_indices = @transform_4, window_bounds = array<i64: 4, 32>}, {pipeline_mode = #tpu.pipeline_mode<synchronous>, transform_indices = @transform_5, window_bounds = array<i64: 1, 32>}, {pipeline_mode = #tpu.pipeline_mode<synchronous>, transform_indices = @transform_6, window_bounds = array<i64: 32, 2>}, {pipeline_mode = #tpu.pipeline_mode<synchronous>, transform_indices = @transform_7, window_bounds = array<i64: 1, 2>}, {transform_indices = @transform_8, window_bounds = array<i64: 1, 1, 2>}]} {
    %c0 = arith.constant 0 : index
    %c0_0 = arith.constant 0 : index
    %c0_1 = arith.constant 0 : index
    %0 = vector.load %arg1[%c0, %c0_0, %c0_1] : memref<1x1x4xf32, #tpu.memory_space<vmem>>, vector<1x1x4xf32>
    %1 = vector.shape_cast %0 : vector<1x1x4xf32> to vector<1x4xf32>
    %c0_2 = arith.constant 0 : index
    %c0_3 = arith.constant 0 : index
    %c0_4 = arith.constant 0 : index
    %2 = vector.load %arg2[%c0_2, %c0_3, %c0_4] : memref<1x8x4xf32, #tpu.memory_space<vmem>>, vector<1x8x4xf32>
    %3 = vector.shape_cast %2 : vector<1x8x4xf32> to vector<8x4xf32>
    %cst = arith.constant dense<0xFF800000> : vector<4xf32>
    %4 = vector.multi_reduction <maximumf>, %3, %cst [0] : vector<8x4xf32> to vector<4xf32>
    %5 = vector.shape_cast %4 : vector<4xf32> to vector<1x4xf32>
    %cst_5 = arith.constant dense<0x7F800000> : vector<4xf32>
    %6 = vector.multi_reduction <minimumf>, %3, %cst_5 [0] : vector<8x4xf32> to vector<4xf32>
    %7 = vector.shape_cast %6 : vector<4xf32> to vector<1x4xf32>
    %c0_6 = arith.constant 0 : index
    %c0_7 = arith.constant 0 : index
    %8 = vector.load %arg3[%c0_6, %c0_7] : memref<4x32xf32, #tpu.memory_space<vmem>>, vector<4x32xf32>
    %cst_8 = arith.constant dense<0.000000e+00> : vector<1x32xf32>
    %9 = tpu.matmul %1, %8, %cst_8 {dimension_numbers = #tpu.dot_dimension_numbers<[1], [0], [0], [1], [0, 0, 1, 1], [], []>} : vector<1x4xf32>, vector<4x32xf32>, vector<1x32xf32> -> vector<1x32xf32>
    %c0_9 = arith.constant 0 : index
    %c0_10 = arith.constant 0 : index
    %10 = vector.load %arg4[%c0_9, %c0_10] : memref<4x32xf32, #tpu.memory_space<vmem>>, vector<4x32xf32>
    %cst_11 = arith.constant dense<0.000000e+00> : vector<1x32xf32>
    %11 = tpu.matmul %5, %10, %cst_11 {dimension_numbers = #tpu.dot_dimension_numbers<[1], [0], [0], [1], [0, 0, 1, 1], [], []>} : vector<1x4xf32>, vector<4x32xf32>, vector<1x32xf32> -> vector<1x32xf32>
    %12 = arith.addf %9, %11 : vector<1x32xf32>
    %c0_12 = arith.constant 0 : index
    %c0_13 = arith.constant 0 : index
    %13 = vector.load %arg5[%c0_12, %c0_13] : memref<4x32xf32, #tpu.memory_space<vmem>>, vector<4x32xf32>
    %cst_14 = arith.constant dense<0.000000e+00> : vector<1x32xf32>
    %14 = tpu.matmul %7, %13, %cst_14 {dimension_numbers = #tpu.dot_dimension_numbers<[1], [0], [0], [1], [0, 0, 1, 1], [], []>} : vector<1x4xf32>, vector<4x32xf32>, vector<1x32xf32> -> vector<1x32xf32>
    %15 = arith.addf %12, %14 : vector<1x32xf32>
    %c0_15 = arith.constant 0 : index
    %c0_16 = arith.constant 0 : index
    %16 = vector.load %arg6[%c0_15, %c0_16] : memref<1x32xf32, #tpu.memory_space<vmem>>, vector<1x32xf32>
    %17 = arith.addf %15, %16 : vector<1x32xf32>
    %cst_17 = arith.constant 0.000000e+00 : f32
    %18 = vector.broadcast %cst_17 : f32 to vector<1x32xf32>
    %19 = arith.maximumf %17, %18 : vector<1x32xf32>
    %c0_18 = arith.constant 0 : index
    %c0_19 = arith.constant 0 : index
    %20 = vector.load %arg7[%c0_18, %c0_19] : memref<32x2xf32, #tpu.memory_space<vmem>>, vector<32x2xf32>
    %cst_20 = arith.constant dense<0.000000e+00> : vector<1x2xf32>
    %21 = tpu.matmul %19, %20, %cst_20 {dimension_numbers = #tpu.dot_dimension_numbers<[1], [0], [0], [1], [0, 0, 1, 1], [], []>} : vector<1x32xf32>, vector<32x2xf32>, vector<1x2xf32> -> vector<1x2xf32>
    %c0_21 = arith.constant 0 : index
    %c0_22 = arith.constant 0 : index
    %22 = vector.load %arg8[%c0_21, %c0_22] : memref<1x2xf32, #tpu.memory_space<vmem>>, vector<1x2xf32>
    %23 = arith.addf %21, %22 : vector<1x2xf32>
    %c0_23 = arith.constant 0 : index
    %c0_24 = arith.constant 0 : index
    %c0_25 = arith.constant 0 : index
    %24 = vector.load %arg9[%c0_23, %c0_24, %c0_25] : memref<1x1x2xf32, #tpu.memory_space<vmem>>, vector<1x1x2xf32>
    %25 = vector.shape_cast %24 : vector<1x1x2xf32> to vector<1x2xf32>
    %26 = vector.shape_cast %23 : vector<1x2xf32> to vector<1x1x2xf32>
    tpu.vector_store %arg9[%c0_23, %c0_24, %c0_25], %26 {strides = array<i32>} : memref<1x1x2xf32, #tpu.memory_space<vmem>>, vector<1x1x2xf32>,
    return
  }
  func.func @transform_0(%arg0: i32) -> (i32, i32, i32) {
    %c0_i32 = arith.constant 0 : i32
    %c0_i32_0 = arith.constant 0 : i32
    %c0_i32_1 = arith.constant 0 : i32
    return %arg0, %c0_i32, %c0_i32_0 : i32, i32, i32
  }
  func.func @transform_1(%arg0: i32) -> (i32, i32, i32) {
    %c0_i32 = arith.constant 0 : i32
    %c0_i32_0 = arith.constant 0 : i32
    %c0_i32_1 = arith.constant 0 : i32
    return %arg0, %c0_i32, %c0_i32_0 : i32, i32, i32
  }
  func.func @transform_2(%arg0: i32) -> (i32, i32) {
    %c0_i32 = arith.constant 0 : i32
    %c0_i32_0 = arith.constant 0 : i32
    %c0_i32_1 = arith.constant 0 : i32
    return %c0_i32, %c0_i32_0 : i32, i32
  }
  func.func @transform_3(%arg0: i32) -> (i32, i32) {
    %c0_i32 = arith.constant 0 : i32
    %c0_i32_0 = arith.constant 0 : i32
    %c0_i32_1 = arith.constant 0 : i32
    return %c0_i32, %c0_i32_0 : i32, i32
  }
  func.func @transform_4(%arg0: i32) -> (i32, i32) {
    %c0_i32 = arith.constant 0 : i32
    %c0_i32_0 = arith.constant 0 : i32
    %c0_i32_1 = arith.constant 0 : i32
    return %c0_i32, %c0_i32_0 : i32, i32
  }
  func.func @transform_5(%arg0: i32) -> (i32, i32) {
    %c0_i32 = arith.constant 0 : i32
    %c0_i32_0 = arith.constant 0 : i32
    %c0_i32_1 = arith.constant 0 : i32
    return %c0_i32, %c0_i32_0 : i32, i32
  }
  func.func @transform_6(%arg0: i32) -> (i32, i32) {
    %c0_i32 = arith.constant 0 : i32
    %c0_i32_0 = arith.constant 0 : i32
    %c0_i32_1 = arith.constant 0 : i32
    return %c0_i32, %c0_i32_0 : i32, i32
  }
  func.func @transform_7(%arg0: i32) -> (i32, i32) {
    %c0_i32 = arith.constant 0 : i32
    %c0_i32_0 = arith.constant 0 : i32
    %c0_i32_1 = arith.constant 0 : i32
    return %c0_i32, %c0_i32_0 : i32, i32
  }
  func.func @transform_8(%arg0: i32) -> (i32, i32, i32) {
    %c0_i32 = arith.constant 0 : i32
    %c0_i32_0 = arith.constant 0 : i32
    %c0_i32_1 = arith.constant 0 : i32
    return %arg0, %c0_i32, %c0_i32_0 : i32, i32, i32
  }
}

module attributes {stable_mosaic.version = 11 : i64} {
  func.func @_order2_kernel(%arg0: i32, %arg1: memref<1x8x4xf32, #tpu.memory_space<vmem>>, %arg2: memref<1x64x4xf32, #tpu.memory_space<vmem>>, %arg3: memref<64x8xf32, #tpu.memory_space<vmem>>, %arg4: memref<4x32xf32, #tpu.memory_space<vmem>>, %arg5: memref<4x32xf32, #tpu.memory_space<vmem>>, %arg6: memref<1x32xf32, #tpu.memory_space<vmem>>, %arg7: memref<32x2xf32, #tpu.memory_space<vmem>>, %arg8: memref<1x2xf32, #tpu.memory_space<vmem>>, %arg9: memref<1x1x2xf32, #tpu.memory_space<vmem>>) attributes {dimension_semantics = [#tpu.dimension_semantics<parallel>], iteration_bounds = array<i64: 2>, scalar_prefetch = 0 : i64, scratch_operands = 0 : i64, tpu.core_type = #tpu.core_type<tc>, window_params = [{transform_indices = @transform_0, window_bounds = array<i64: 1, 8, 4>}, {transform_indices = @transform_1, window_bounds = array<i64: 1, 64, 4>}, {pipeline_mode = #tpu.pipeline_mode<synchronous>, transform_indices = @transform_2, window_bounds = array<i64: 64, 8>}, {pipeline_mode = #tpu.pipeline_mode<synchronous>, transform_indices = @transform_3, window_bounds = array<i64: 4, 32>}, {pipeline_mode = #tpu.pipeline_mode<synchronous>, transform_indices = @transform_4, window_bounds = array<i64: 4, 32>}, {pipeline_mode = #tpu.pipeline_mode<synchronous>, transform_indices = @transform_5, window_bounds = array<i64: 1, 32>}, {pipeline_mode = #tpu.pipeline_mode<synchronous>, transform_indices = @transform_6, window_bounds = array<i64: 32, 2>}, {pipeline_mode = #tpu.pipeline_mode<synchronous>, transform_indices = @transform_7, window_bounds = array<i64: 1, 2>}, {transform_indices = @transform_8, window_bounds = array<i64: 1, 1, 2>}]} {
    %c0 = arith.constant 0 : index
    %c0_0 = arith.constant 0 : index
    %c0_1 = arith.constant 0 : index
    %0 = vector.load %arg1[%c0, %c0_0, %c0_1] : memref<1x8x4xf32, #tpu.memory_space<vmem>>, vector<1x8x4xf32>
    %1 = vector.shape_cast %0 : vector<1x8x4xf32> to vector<8x4xf32>
    %c0_2 = arith.constant 0 : index
    %c0_3 = arith.constant 0 : index
    %c0_4 = arith.constant 0 : index
    %2 = vector.load %arg2[%c0_2, %c0_3, %c0_4] : memref<1x64x4xf32, #tpu.memory_space<vmem>>, vector<1x64x4xf32>
    %3 = vector.shape_cast %2 : vector<1x64x4xf32> to vector<64x4xf32>
    %c0_5 = arith.constant 0 : index
    %c0_6 = arith.constant 0 : index
    %4 = vector.load %arg4[%c0_5, %c0_6] : memref<4x32xf32, #tpu.memory_space<vmem>>, vector<4x32xf32>
    %cst = arith.constant dense<0.000000e+00> : vector<8x32xf32>
    %5 = tpu.matmul %1, %4, %cst {dimension_numbers = #tpu.dot_dimension_numbers<[1], [0], [0], [1], [0, 0, 1, 1], [], []>} : vector<8x4xf32>, vector<4x32xf32>, vector<8x32xf32> -> vector<8x32xf32>
    %c0_7 = arith.constant 0 : index
    %c0_8 = arith.constant 0 : index
    %6 = vector.load %arg3[%c0_7, %c0_8] : memref<64x8xf32, #tpu.memory_space<vmem>>, vector<64x8xf32>
    %cst_9 = arith.constant dense<0.000000e+00> : vector<64x32xf32>
    %7 = tpu.matmul %6, %5, %cst_9 {dimension_numbers = #tpu.dot_dimension_numbers<[1], [0], [0], [1], [0, 0, 1, 1], [], []>} : vector<64x8xf32>, vector<8x32xf32>, vector<64x32xf32> -> vector<64x32xf32>
    %c0_10 = arith.constant 0 : index
    %c0_11 = arith.constant 0 : index
    %8 = vector.load %arg5[%c0_10, %c0_11] : memref<4x32xf32, #tpu.memory_space<vmem>>, vector<4x32xf32>
    %cst_12 = arith.constant dense<0.000000e+00> : vector<64x32xf32>
    %9 = tpu.matmul %3, %8, %cst_12 {dimension_numbers = #tpu.dot_dimension_numbers<[1], [0], [0], [1], [0, 0, 1, 1], [], []>} : vector<64x4xf32>, vector<4x32xf32>, vector<64x32xf32> -> vector<64x32xf32>
    %10 = arith.addf %7, %9 : vector<64x32xf32>
    %c0_13 = arith.constant 0 : index
    %c0_14 = arith.constant 0 : index
    %11 = vector.load %arg6[%c0_13, %c0_14] : memref<1x32xf32, #tpu.memory_space<vmem>>, vector<1x32xf32>
    %12 = vector.broadcast %11 : vector<1x32xf32> to vector<64x32xf32>
    %13 = arith.addf %10, %12 : vector<64x32xf32>
    %cst_15 = arith.constant 0.000000e+00 : f32
    %14 = vector.broadcast %cst_15 : f32 to vector<64x32xf32>
    %15 = arith.maximumf %13, %14 : vector<64x32xf32>
    %c0_16 = arith.constant 0 : index
    %c0_17 = arith.constant 0 : index
    %16 = vector.load %arg7[%c0_16, %c0_17] : memref<32x2xf32, #tpu.memory_space<vmem>>, vector<32x2xf32>
    %cst_18 = arith.constant dense<0.000000e+00> : vector<64x2xf32>
    %17 = tpu.matmul %15, %16, %cst_18 {dimension_numbers = #tpu.dot_dimension_numbers<[1], [0], [0], [1], [0, 0, 1, 1], [], []>} : vector<64x32xf32>, vector<32x2xf32>, vector<64x2xf32> -> vector<64x2xf32>
    %c0_19 = arith.constant 0 : index
    %c0_20 = arith.constant 0 : index
    %18 = vector.load %arg8[%c0_19, %c0_20] : memref<1x2xf32, #tpu.memory_space<vmem>>, vector<1x2xf32>
    %19 = vector.broadcast %18 : vector<1x2xf32> to vector<64x2xf32>
    %20 = arith.addf %17, %19 : vector<64x2xf32>
    %cst_21 = arith.constant dense<0xFF800000> : vector<2xf32>
    %21 = vector.multi_reduction <maximumf>, %20, %cst_21 [0] : vector<64x2xf32> to vector<2xf32>
    %22 = vector.shape_cast %21 : vector<2xf32> to vector<1x2xf32>
    %c0_22 = arith.constant 0 : index
    %c0_23 = arith.constant 0 : index
    %c0_24 = arith.constant 0 : index
    %23 = vector.load %arg9[%c0_22, %c0_23, %c0_24] : memref<1x1x2xf32, #tpu.memory_space<vmem>>, vector<1x1x2xf32>
    %24 = vector.shape_cast %23 : vector<1x1x2xf32> to vector<1x2xf32>
    %25 = vector.shape_cast %22 : vector<1x2xf32> to vector<1x1x2xf32>
    tpu.vector_store %arg9[%c0_22, %c0_23, %c0_24], %25 {strides = array<i32>} : memref<1x1x2xf32, #tpu.memory_space<vmem>>, vector<1x1x2xf32>,
    return
  }
  func.func @transform_0(%arg0: i32) -> (i32, i32, i32) {
    %c0_i32 = arith.constant 0 : i32
    %c0_i32_0 = arith.constant 0 : i32
    %c0_i32_1 = arith.constant 0 : i32
    return %arg0, %c0_i32, %c0_i32_0 : i32, i32, i32
  }
  func.func @transform_1(%arg0: i32) -> (i32, i32, i32) {
    %c0_i32 = arith.constant 0 : i32
    %c0_i32_0 = arith.constant 0 : i32
    %c0_i32_1 = arith.constant 0 : i32
    return %arg0, %c0_i32, %c0_i32_0 : i32, i32, i32
  }
  func.func @transform_2(%arg0: i32) -> (i32, i32) {
    %c0_i32 = arith.constant 0 : i32
    %c0_i32_0 = arith.constant 0 : i32
    %c0_i32_1 = arith.constant 0 : i32
    return %c0_i32, %c0_i32_0 : i32, i32
  }
  func.func @transform_3(%arg0: i32) -> (i32, i32) {
    %c0_i32 = arith.constant 0 : i32
    %c0_i32_0 = arith.constant 0 : i32
    %c0_i32_1 = arith.constant 0 : i32
    return %c0_i32, %c0_i32_0 : i32, i32
  }
  func.func @transform_4(%arg0: i32) -> (i32, i32) {
    %c0_i32 = arith.constant 0 : i32
    %c0_i32_0 = arith.constant 0 : i32
    %c0_i32_1 = arith.constant 0 : i32
    return %c0_i32, %c0_i32_0 : i32, i32
  }
  func.func @transform_5(%arg0: i32) -> (i32, i32) {
    %c0_i32 = arith.constant 0 : i32
    %c0_i32_0 = arith.constant 0 : i32
    %c0_i32_1 = arith.constant 0 : i32
    return %c0_i32, %c0_i32_0 : i32, i32
  }
  func.func @transform_6(%arg0: i32) -> (i32, i32) {
    %c0_i32 = arith.constant 0 : i32
    %c0_i32_0 = arith.constant 0 : i32
    %c0_i32_1 = arith.constant 0 : i32
    return %c0_i32, %c0_i32_0 : i32, i32
  }
  func.func @transform_7(%arg0: i32) -> (i32, i32) {
    %c0_i32 = arith.constant 0 : i32
    %c0_i32_0 = arith.constant 0 : i32
    %c0_i32_1 = arith.constant 0 : i32
    return %c0_i32, %c0_i32_0 : i32, i32
  }
  func.func @transform_8(%arg0: i32) -> (i32, i32, i32) {
    %c0_i32 = arith.constant 0 : i32
    %c0_i32_0 = arith.constant 0 : i32
    %c0_i32_1 = arith.constant 0 : i32
    return %arg0, %c0_i32, %c0_i32_0 : i32, i32, i32
  }
}

module attributes {stable_mosaic.version = 11 : i64} {
  func.func @_order1_kernel(%arg0: i32, %arg1: memref<1x1x4xf32, #tpu.memory_space<vmem>>, %arg2: memref<1x8x4xf32, #tpu.memory_space<vmem>>, %arg3: memref<1x8x8x4xf32, #tpu.memory_space<vmem>>, %arg4: memref<4x32xf32, #tpu.memory_space<vmem>>, %arg5: memref<4x32xf32, #tpu.memory_space<vmem>>, %arg6: memref<4x32xf32, #tpu.memory_space<vmem>>, %arg7: memref<4x32xf32, #tpu.memory_space<vmem>>, %arg8: memref<1x32xf32, #tpu.memory_space<vmem>>, %arg9: memref<32x3xf32, #tpu.memory_space<vmem>>, %arg10: memref<1x3xf32, #tpu.memory_space<vmem>>, %arg11: memref<1x1x3xf32, #tpu.memory_space<vmem>>) attributes {dimension_semantics = [#tpu.dimension_semantics<parallel>], iteration_bounds = array<i64: 2>, scalar_prefetch = 0 : i64, scratch_operands = 0 : i64, tpu.core_type = #tpu.core_type<tc>, window_params = [{transform_indices = @transform_0, window_bounds = array<i64: 1, 1, 4>}, {transform_indices = @transform_1, window_bounds = array<i64: 1, 8, 4>}, {transform_indices = @transform_2, window_bounds = array<i64: 1, 8, 8, 4>}, {pipeline_mode = #tpu.pipeline_mode<synchronous>, transform_indices = @transform_3, window_bounds = array<i64: 4, 32>}, {pipeline_mode = #tpu.pipeline_mode<synchronous>, transform_indices = @transform_4, window_bounds = array<i64: 4, 32>}, {pipeline_mode = #tpu.pipeline_mode<synchronous>, transform_indices = @transform_5, window_bounds = array<i64: 4, 32>}, {pipeline_mode = #tpu.pipeline_mode<synchronous>, transform_indices = @transform_6, window_bounds = array<i64: 4, 32>}, {pipeline_mode = #tpu.pipeline_mode<synchronous>, transform_indices = @transform_7, window_bounds = array<i64: 1, 32>}, {pipeline_mode = #tpu.pipeline_mode<synchronous>, transform_indices = @transform_8, window_bounds = array<i64: 32, 3>}, {pipeline_mode = #tpu.pipeline_mode<synchronous>, transform_indices = @transform_9, window_bounds = array<i64: 1, 3>}, {transform_indices = @transform_10, window_bounds = array<i64: 1, 1, 3>}]} {
    %c0 = arith.constant 0 : index
    %c0_0 = arith.constant 0 : index
    %c0_1 = arith.constant 0 : index
    %0 = vector.load %arg1[%c0, %c0_0, %c0_1] : memref<1x1x4xf32, #tpu.memory_space<vmem>>, vector<1x1x4xf32>
    %1 = vector.shape_cast %0 : vector<1x1x4xf32> to vector<1x4xf32>
    %c0_2 = arith.constant 0 : index
    %c0_3 = arith.constant 0 : index
    %c0_4 = arith.constant 0 : index
    %2 = vector.load %arg2[%c0_2, %c0_3, %c0_4] : memref<1x8x4xf32, #tpu.memory_space<vmem>>, vector<1x8x4xf32>
    %3 = vector.shape_cast %2 : vector<1x8x4xf32> to vector<8x4xf32>
    %c0_5 = arith.constant 0 : index
    %c0_6 = arith.constant 0 : index
    %c0_7 = arith.constant 0 : index
    %c0_8 = arith.constant 0 : index
    %4 = vector.load %arg3[%c0_5, %c0_6, %c0_7, %c0_8] : memref<1x8x8x4xf32, #tpu.memory_space<vmem>>, vector<1x8x8x4xf32>
    %5 = vector.shape_cast %4 : vector<1x8x8x4xf32> to vector<8x8x4xf32>
    %6 = tpu.iota {dimensions = array<i32: 0>} : vector<8x8x4xi32>
    %7 = tpu.iota {dimensions = array<i32: 1>} : vector<8x8x4xi32>
    %8 = arith.cmpi ne, %6, %7 : vector<8x8x4xi32>
    %cst = arith.constant 0.000000e+00 : f32
    %9 = vector.broadcast %cst : f32 to vector<8x8x4xf32>
    %10 = arith.select %8, %5, %9 : vector<8x8x4xi1>, vector<8x8x4xf32>
    %cst_9 = arith.constant dense<0xFF800000> : vector<8x4xf32>
    %11 = vector.multi_reduction <maximumf>, %10, %cst_9 [1] : vector<8x8x4xf32> to vector<8x4xf32>
    %cst_10 = arith.constant 1.000000e+00 : f32
    %12 = vector.broadcast %cst_10 : f32 to vector<8x8x4xf32>
    %13 = arith.select %8, %5, %12 : vector<8x8x4xi1>, vector<8x8x4xf32>
    %cst_11 = arith.constant dense<0x7F800000> : vector<8x4xf32>
    %14 = vector.multi_reduction <minimumf>, %13, %cst_11 [1] : vector<8x8x4xf32> to vector<8x4xf32>
    %c0_12 = arith.constant 0 : index
    %c0_13 = arith.constant 0 : index
    %15 = vector.load %arg4[%c0_12, %c0_13] : memref<4x32xf32, #tpu.memory_space<vmem>>, vector<4x32xf32>
    %cst_14 = arith.constant dense<0.000000e+00> : vector<1x32xf32>
    %16 = tpu.matmul %1, %15, %cst_14 {dimension_numbers = #tpu.dot_dimension_numbers<[1], [0], [0], [1], [0, 0, 1, 1], [], []>} : vector<1x4xf32>, vector<4x32xf32>, vector<1x32xf32> -> vector<1x32xf32>
    %c0_15 = arith.constant 0 : index
    %c0_16 = arith.constant 0 : index
    %17 = vector.load %arg5[%c0_15, %c0_16] : memref<4x32xf32, #tpu.memory_space<vmem>>, vector<4x32xf32>
    %cst_17 = arith.constant dense<0.000000e+00> : vector<8x32xf32>
    %18 = tpu.matmul %3, %17, %cst_17 {dimension_numbers = #tpu.dot_dimension_numbers<[1], [0], [0], [1], [0, 0, 1, 1], [], []>} : vector<8x4xf32>, vector<4x32xf32>, vector<8x32xf32> -> vector<8x32xf32>
    %19 = vector.broadcast %16 : vector<1x32xf32> to vector<8x32xf32>
    %20 = arith.addf %19, %18 : vector<8x32xf32>
    %c0_18 = arith.constant 0 : index
    %c0_19 = arith.constant 0 : index
    %21 = vector.load %arg6[%c0_18, %c0_19] : memref<4x32xf32, #tpu.memory_space<vmem>>, vector<4x32xf32>
    %cst_20 = arith.constant dense<0.000000e+00> : vector<8x32xf32>
    %22 = tpu.matmul %11, %21, %cst_20 {dimension_numbers = #tpu.dot_dimension_numbers<[1], [0], [0], [1], [0, 0, 1, 1], [], []>} : vector<8x4xf32>, vector<4x32xf32>, vector<8x32xf32> -> vector<8x32xf32>
    %23 = arith.addf %20, %22 : vector<8x32xf32>
    %c0_21 = arith.constant 0 : index
    %c0_22 = arith.constant 0 : index
    %24 = vector.load %arg7[%c0_21, %c0_22] : memref<4x32xf32, #tpu.memory_space<vmem>>, vector<4x32xf32>
    %cst_23 = arith.constant dense<0.000000e+00> : vector<8x32xf32>
    %25 = tpu.matmul %14, %24, %cst_23 {dimension_numbers = #tpu.dot_dimension_numbers<[1], [0], [0], [1], [0, 0, 1, 1], [], []>} : vector<8x4xf32>, vector<4x32xf32>, vector<8x32xf32> -> vector<8x32xf32>
    %26 = arith.addf %23, %25 : vector<8x32xf32>
    %c0_24 = arith.constant 0 : index
    %c0_25 = arith.constant 0 : index
    %27 = vector.load %arg8[%c0_24, %c0_25] : memref<1x32xf32, #tpu.memory_space<vmem>>, vector<1x32xf32>
    %28 = vector.broadcast %27 : vector<1x32xf32> to vector<8x32xf32>
    %29 = arith.addf %26, %28 : vector<8x32xf32>
    %cst_26 = arith.constant 0.000000e+00 : f32
    %30 = vector.broadcast %cst_26 : f32 to vector<8x32xf32>
    %31 = arith.maximumf %29, %30 : vector<8x32xf32>
    %c0_27 = arith.constant 0 : index
    %c0_28 = arith.constant 0 : index
    %32 = vector.load %arg9[%c0_27, %c0_28] : memref<32x3xf32, #tpu.memory_space<vmem>>, vector<32x3xf32>
    %cst_29 = arith.constant dense<0.000000e+00> : vector<8x3xf32>
    %33 = tpu.matmul %31, %32, %cst_29 {dimension_numbers = #tpu.dot_dimension_numbers<[1], [0], [0], [1], [0, 0, 1, 1], [], []>} : vector<8x32xf32>, vector<32x3xf32>, vector<8x3xf32> -> vector<8x3xf32>
    %c0_30 = arith.constant 0 : index
    %c0_31 = arith.constant 0 : index
    %34 = vector.load %arg10[%c0_30, %c0_31] : memref<1x3xf32, #tpu.memory_space<vmem>>, vector<1x3xf32>
    %35 = vector.broadcast %34 : vector<1x3xf32> to vector<8x3xf32>
    %36 = arith.addf %33, %35 : vector<8x3xf32>
    %cst_32 = arith.constant dense<0xFF800000> : vector<3xf32>
    %37 = vector.multi_reduction <maximumf>, %36, %cst_32 [0] : vector<8x3xf32> to vector<3xf32>
    %38 = vector.shape_cast %37 : vector<3xf32> to vector<1x3xf32>
    %c0_33 = arith.constant 0 : index
    %c0_34 = arith.constant 0 : index
    %c0_35 = arith.constant 0 : index
    %39 = vector.load %arg11[%c0_33, %c0_34, %c0_35] : memref<1x1x3xf32, #tpu.memory_space<vmem>>, vector<1x1x3xf32>
    %40 = vector.shape_cast %39 : vector<1x1x3xf32> to vector<1x3xf32>
    %41 = vector.shape_cast %38 : vector<1x3xf32> to vector<1x1x3xf32>
    tpu.vector_store %arg11[%c0_33, %c0_34, %c0_35], %41 {strides = array<i32>} : memref<1x1x3xf32, #tpu.memory_space<vmem>>, vector<1x1x3xf32>,
    return
  }
  func.func @transform_0(%arg0: i32) -> (i32, i32, i32) {
    %c0_i32 = arith.constant 0 : i32
    %c0_i32_0 = arith.constant 0 : i32
    %c0_i32_1 = arith.constant 0 : i32
    return %arg0, %c0_i32, %c0_i32_0 : i32, i32, i32
  }
  func.func @transform_1(%arg0: i32) -> (i32, i32, i32) {
    %c0_i32 = arith.constant 0 : i32
    %c0_i32_0 = arith.constant 0 : i32
    %c0_i32_1 = arith.constant 0 : i32
    return %arg0, %c0_i32, %c0_i32_0 : i32, i32, i32
  }
  func.func @transform_2(%arg0: i32) -> (i32, i32, i32, i32) {
    %c0_i32 = arith.constant 0 : i32
    %c0_i32_0 = arith.constant 0 : i32
    %c0_i32_1 = arith.constant 0 : i32
    %c0_i32_2 = arith.constant 0 : i32
    return %arg0, %c0_i32, %c0_i32_0, %c0_i32_1 : i32, i32, i32, i32
  }
  func.func @transform_3(%arg0: i32) -> (i32, i32) {
    %c0_i32 = arith.constant 0 : i32
    %c0_i32_0 = arith.constant 0 : i32
    %c0_i32_1 = arith.constant 0 : i32
    return %c0_i32, %c0_i32_0 : i32, i32
  }
  func.func @transform_4(%arg0: i32) -> (i32, i32) {
    %c0_i32 = arith.constant 0 : i32
    %c0_i32_0 = arith.constant 0 : i32
    %c0_i32_1 = arith.constant 0 : i32
    return %c0_i32, %c0_i32_0 : i32, i32
  }
  func.func @transform_5(%arg0: i32) -> (i32, i32) {
    %c0_i32 = arith.constant 0 : i32
    %c0_i32_0 = arith.constant 0 : i32
    %c0_i32_1 = arith.constant 0 : i32
    return %c0_i32, %c0_i32_0 : i32, i32
  }
  func.func @transform_6(%arg0: i32) -> (i32, i32) {
    %c0_i32 = arith.constant 0 : i32
    %c0_i32_0 = arith.constant 0 : i32
    %c0_i32_1 = arith.constant 0 : i32
    return %c0_i32, %c0_i32_0 : i32, i32
  }
  func.func @transform_7(%arg0: i32) -> (i32, i32) {
    %c0_i32 = arith.constant 0 : i32
    %c0_i32_0 = arith.constant 0 : i32
    %c0_i32_1 = arith.constant 0 : i32
    return %c0_i32, %c0_i32_0 : i32, i32
  }
  func.func @transform_8(%arg0: i32) -> (i32, i32) {
    %c0_i32 = arith.constant 0 : i32
    %c0_i32_0 = arith.constant 0 : i32
    %c0_i32_1 = arith.constant 0 : i32
    return %c0_i32, %c0_i32_0 : i32, i32
  }
  func.func @transform_9(%arg0: i32) -> (i32, i32) {
    %c0_i32 = arith.constant 0 : i32
    %c0_i32_0 = arith.constant 0 : i32
    %c0_i32_1 = arith.constant 0 : i32
    return %c0_i32, %c0_i32_0 : i32, i32
  }
  func.func @transform_10(%arg0: i32) -> (i32, i32, i32) {
    %c0_i32 = arith.constant 0 : i32
    %c0_i32_0 = arith.constant 0 : i32
    %c0_i32_1 = arith.constant 0 : i32
    return %arg0, %c0_i32, %c0_i32_0 : i32, i32, i32
  }
}

module attributes {stable_mosaic.version = 11 : i64} {
  func.func @_planner_head_kernel(%arg0: memref<2x7xf32, #tpu.memory_space<vmem>>, %arg1: memref<7x8xf32, #tpu.memory_space<vmem>>, %arg2: memref<7x8xf32, #tpu.memory_space<vmem>>, %arg3: memref<2x8xf32, #tpu.memory_space<vmem>>) attributes {dimension_semantics = [], scalar_prefetch = 0 : i64, scratch_operands = 0 : i64, tpu.core_type = #tpu.core_type<tc>} {
    %c0 = arith.constant 0 : index
    %c0_0 = arith.constant 0 : index
    %0 = vector.load %arg0[%c0, %c0_0] : memref<2x7xf32, #tpu.memory_space<vmem>>, vector<2x7xf32>
    %cst = arith.constant 0.000000e+00 : f32
    %1 = vector.broadcast %cst : f32 to vector<2x7xf32>
    %2 = arith.subf %1, %0 : vector<2x7xf32>
    %cst_1 = arith.constant 0.000000e+00 : f32
    %3 = vector.broadcast %cst_1 : f32 to vector<2x7xf32>
    %4 = arith.minimumf %2, %3 : vector<2x7xf32>
    %5 = math.absf %2 : vector<2x7xf32>
    %cst_2 = arith.constant 0.000000e+00 : f32
    %6 = vector.broadcast %cst_2 : f32 to vector<2x7xf32>
    %7 = arith.subf %6, %5 : vector<2x7xf32>
    %8 = math.exp %7 : vector<2x7xf32>
    %cst_3 = arith.constant 1.000000e+00 : f32
    %9 = vector.broadcast %cst_3 : f32 to vector<2x7xf32>
    %10 = arith.addf %9, %8 : vector<2x7xf32>
    %11 = math.log %10 : vector<2x7xf32>
    %12 = arith.subf %4, %11 : vector<2x7xf32>
    %c0_4 = arith.constant 0 : index
    %c0_5 = arith.constant 0 : index
    %13 = vector.load %arg1[%c0_4, %c0_5] : memref<7x8xf32, #tpu.memory_space<vmem>>, vector<7x8xf32>
    %cst_6 = arith.constant dense<0.000000e+00> : vector<2x8xf32>
    %14 = tpu.matmul %12, %13, %cst_6 {dimension_numbers = #tpu.dot_dimension_numbers<[1], [0], [0], [1], [0, 0, 1, 1], [], []>} : vector<2x7xf32>, vector<7x8xf32>, vector<2x8xf32> -> vector<2x8xf32>
    %cst_7 = arith.constant 0.000000e+00 : f32
    %15 = vector.broadcast %cst_7 : f32 to vector<2x7xf32>
    %16 = arith.minimumf %0, %15 : vector<2x7xf32>
    %17 = math.absf %0 : vector<2x7xf32>
    %cst_8 = arith.constant 0.000000e+00 : f32
    %18 = vector.broadcast %cst_8 : f32 to vector<2x7xf32>
    %19 = arith.subf %18, %17 : vector<2x7xf32>
    %20 = math.exp %19 : vector<2x7xf32>
    %cst_9 = arith.constant 1.000000e+00 : f32
    %21 = vector.broadcast %cst_9 : f32 to vector<2x7xf32>
    %22 = arith.addf %21, %20 : vector<2x7xf32>
    %23 = math.log %22 : vector<2x7xf32>
    %24 = arith.subf %16, %23 : vector<2x7xf32>
    %c0_10 = arith.constant 0 : index
    %c0_11 = arith.constant 0 : index
    %25 = vector.load %arg2[%c0_10, %c0_11] : memref<7x8xf32, #tpu.memory_space<vmem>>, vector<7x8xf32>
    %cst_12 = arith.constant dense<0.000000e+00> : vector<2x8xf32>
    %26 = tpu.matmul %24, %25, %cst_12 {dimension_numbers = #tpu.dot_dimension_numbers<[1], [0], [0], [1], [0, 0, 1, 1], [], []>} : vector<2x7xf32>, vector<7x8xf32>, vector<2x8xf32> -> vector<2x8xf32>
    %27 = arith.addf %14, %26 : vector<2x8xf32>
    %c0_13 = arith.constant 0 : index
    %c0_14 = arith.constant 0 : index
    %28 = vector.load %arg3[%c0_13, %c0_14] : memref<2x8xf32, #tpu.memory_space<vmem>>, vector<2x8xf32>
    tpu.vector_store %arg3[%c0_13, %c0_14], %27 {strides = array<i32>} : memref<2x8xf32, #tpu.memory_space<vmem>>, vector<2x8xf32>,
    return
  }
}

</mosaic_0001>

<bundles_post_ra>
// kernel: planner_forward.4
= control target key start
LH: loop header
LB: loop body
LE: loop exit
PB: predicated region body
PF: predicated region fallthrough
CT: control target
= control target key end

     0   :  { %s579_s27 = smov 0   ;;  %s636_s0 = inlined_call_operand.vmem [shape: f32[2,1,4], index: 0, kind: input, shape index: {}]   ;;  %s637_s1 = inlined_call_operand.vmem [shape: f32[2,8,4], index: 1, kind: input, shape index: {}]   ;;  %s638_s2 = inlined_call_operand.vmem [shape: f32[4,32], index: 2, kind: input, shape index: {}]   ;;  %s639_s3 = inlined_call_operand.vmem [shape: f32[4,32], index: 3, kind: input, shape index: {}]   ;;  %s640_s4 = inlined_call_operand.vmem [shape: f32[4,32], index: 4, kind: input, shape index: {}]   ;;  %s641_s5 = inlined_call_operand.vmem [shape: f32[1,32], index: 5, kind: input, shape index: {}]   ;;  %s642_s6 = inlined_call_operand.vmem [shape: f32[32,2], index: 6, kind: input, shape index: {}]   ;;  %s643_s7 = inlined_call_operand.vmem [shape: f32[1,2], index: 7, kind: input, shape index: {}]   ;;  %s644_s8 = inlined_call_operand.vmem [shape: f32[2,1,2], index: 8, kind: output, shape index: {}]  }
   0x1 LB: > { %s503_s28 = sadd.s32 4294967295, %s532_s27   ;;  %p507_p0 = scmp.ge.s32.totalorder %s532_s27, 1  ;;  %s532_s27 = sphi %s579_s27, %s18_s27  }
   0x2   : > { %p269_p1 = scmp.lt.s32.totalorder %s532_s27, 3 }
   0x4   : > { %p270_p2 = pnand %p507_p0, %p269_p1 }
   0x5   : > { %p303_p3 = scmp.lt.s32.totalorder (!%p270_p2), %s503_s28, 1 }
   0x6   : > { %273 = sbr.rel (%p270_p2) target bundleno = 302 (0x12e), region = 52 }
   0xb   : > { %vm335_vm0 = vcmask 1043456   ;;  %v385_v0 = vld [vmem:[%s640_s4] sm:$0xf]  ;;  %s646_s28 = smov (!%p303_p3, %s503_s28), 1  ;;  %vm315_vm1 = vcmask 31744   ;;  %v419_v19 = vld [vmem:[%s642_s6 + $0x18] sm:$0xff] }
   0xc   : > { %513 = vmatpush.msk.msra.mxu2 %vm335_vm0, %v385_v0  ;;  %v331_v1 = vld [vmem:[%s639_s3] sm:$0xf]  ;;  %s508_s13 = sshll.u32 %s646_s28, 3  ;;  %s305_s16 = scalar_lea.vmem %s636_s0, %s646_s28  ;;  %437 = vmatpush.msra.mxu3 %v419_v19  ;;  %v418_v20 = vld [vmem:[%s642_s6 + $0x10] sm:$0xff]  ;;  %v417_v21 = vld [vmem:[%s642_s6 + $0x8] sm:$0xff]  ;;  %vm421_vm2 = vcmask 261120  }
   0xd   : > { %v330_v2 = vld [vmem:[%s638_s2] sm:$0xf]  ;;  %509 = vmatpush.msk.msra.mxu0 %vm335_vm0, %v331_v1  ;;  %s309_s19 = scalar_lea.vmem %s637_s1, %s508_s13  ;;  %s312_s14 = scalar_lea.vmem %s644_s8, %s646_s28  ;;  %vm445_vm3 = vcmask 8192  }
   0xe   : > { %511 = vmatpush.msk.msra.mxu1 %vm335_vm0, %v330_v2  ;;  %v313_v3 = vld [vmem:[%s305_s16] sm:$0x1]  ;;  %438 = vmatpush.msra.mxu3 %v418_v20 }
   0xf   : > { %v314_v4 = vld [vmem:[%s309_s19] sm:$0xff]  ;;  %512 = vmatmul.msk.f32.vlgmr.msra.gmra.mxu1 %vm315_vm1, %v313_v3 }
  0x10   : > { %v323_v5 = vsel %vm315_vm1, %v314_v4, inf  ;;  %v316_v6 = vsel %vm315_vm1, %v314_v4, -inf  ;;  %439 = vmatpush.msra.mxu3 %v417_v21  ;;  %v416_v22 = vld [vmem:[%s642_s6] sm:$0xff] }
  0x11   : > { %v324_v7 = vrot.slane %v323_v5, 4  ;;  %v317_v8 = vrot.slane %v316_v6, 4  ;;  %v413_v27 = vld [vmem:[%s641_s5] sm:$0x1] }
  0x12   : > { %440 = vmatpush.msra.mxu3 %v416_v22  ;;  %v420_v31 = vld [vmem:[%s643_s7] sm:$0x1] }
  0x13   : > { %v325_v9 = vmin.f32 %v323_v5, %v324_v7  ;;  %v318_v10 = vmax.f32 %v316_v6, %v317_v8 }
  0x15   : > { %v326_v11 = vrot.slane %v325_v9, 2  ;;  %v319_v12 = vrot.slane %v318_v10, 2 }
  0x17   : > { %v327_v13 = vmin.f32 %v325_v9, %v326_v11  ;;  %v320_v14 = vmax.f32 %v318_v10, %v319_v12 }
  0x19   : > { %v328_v15 = vrot.slane %v327_v13, 1  ;;  %v321_v16 = vrot.slane %v320_v14, 1 }
  0x1b   : > { %v329_v17 = vmin.f32 %v327_v13, %v328_v15  ;;  %v322_v18 = vmax.f32 %v320_v14, %v321_v16 }
  0x1d   : > { %514 = vmatmul.msk.f32.vlgmr.msra.gmra.mxu2 %vm315_vm1, %v329_v17  ;;  %510 = vmatmul.msk.f32.vlgmr.msra.gmra.mxu0 %vm315_vm1, %v322_v18 }
  0x8c   : > { %v382_v24 = vpop.f32.mrf.mxu1 }
  0x9a   : > { %v356_v23 = vpop.f32.mrf.mxu0 }
  0x9b   : > { %v383_v25 = vadd.f32 %v382_v24, %v356_v23 }
  0xa0   : > { %v409_v26 = vpop.f32.mrf.mxu2 }
  0xa1   : > { %v412_v28 = vadd.f32 %v409_v26, %v383_v25 }
  0xa3   : > { %v414_v29 = vadd.f32 %v413_v27, %v412_v28 }
  0xa5   : > { %v415_v30 = vmax.f32 %v414_v29, 0.0 }
  0xa7   : > { %515 = vmatmul.msk.f32.vlgmr.msra.gmra.mxu3 %vm421_vm2, %v415_v30 }
 0x12a   : > { %v442_v32 = vpop.f32.mrf.mxu3 }
 0x12b   : > { %v443_v33 = vadd.f32 %v442_v32, %v420_v31 }
 0x12d   : > { %446 = vst.msk [vmem:[%s312_s14] sm:$0x1] %vm445_vm3, %v443_v33 }
 0x12e PF: > { %s18_s27 = sadd.s32 1, %s532_s27  }
 0x12f   : > { %p15_p4 = scmp.ge.s32.totalorder %s18_s27, 4  }
 0x131   :  { %17 = sbr.rel (!%p15_p4) target bundleno = 1 (0x1), region = 85 }

// kernel: planner_forward.6
= control target key start
LH: loop header
LB: loop body
LE: loop exit
PB: predicated region body
PF: predicated region fallthrough
CT: control target
= control target key end

     0   :  { %s784_s27 = smov 0   ;;  %s882_s0 = inlined_call_operand.vmem [shape: f32[2,8,4], index: 0, kind: input, shape index: {}]   ;;  %s883_s1 = inlined_call_operand.vmem [shape: f32[2,64,4], index: 1, kind: input, shape index: {}]   ;;  %s884_s2 = inlined_call_operand.vmem [shape: f32[64,8], index: 2, kind: input, shape index: {}]   ;;  %s885_s3 = inlined_call_operand.vmem [shape: f32[4,32], index: 3, kind: input, shape index: {}]   ;;  %s886_s4 = inlined_call_operand.vmem [shape: f32[4,32], index: 4, kind: input, shape index: {}]   ;;  %s887_s5 = inlined_call_operand.vmem [shape: f32[1,32], index: 5, kind: input, shape index: {}]   ;;  %s888_s6 = inlined_call_operand.vmem [shape: f32[32,2], index: 6, kind: input, shape index: {}]   ;;  %s889_s7 = inlined_call_operand.vmem [shape: f32[1,2], index: 7, kind: input, shape index: {}]   ;;  %s890_s8 = inlined_call_operand.vmem [shape: f32[2,1,2], index: 8, kind: output, shape index: {}]  }
   0x1 LB: > { %s677_s28 = sadd.s32 4294967295, %s737_s27   ;;  %p681_p0 = scmp.ge.s32.totalorder %s737_s27, 1  ;;  %s737_s27 = sphi %s784_s27, %s18_s27  }
   0x2   : > { %p271_p1 = scmp.lt.s32.totalorder %s737_s27, 3 }
   0x4   : > { %p272_p2 = pnand %p681_p0, %p271_p1 }
   0x5   : > { %p307_p3 = scmp.lt.s32.totalorder (!%p272_p2), %s677_s28, 1 }
   0x6   : > { %275 = sbr.rel (%p272_p2) target bundleno = 482 (0x1e2), region = 52 }
   0xb   : > { %v328_v0 = vld [vmem:[%s885_s3] sm:$0xf]  ;;  %vm333_vm0 = vcmask 1043456   ;;  %s892_s28 = smov (!%p307_p3, %s677_s28), 1  ;;  %vm329_vm1 = vcmask 31744   ;;  %vm434_vm2 = vcmask 64512  }
   0xc   : > { %685 = vmatpush.msk.msra.mxu0 %vm333_vm0, %v328_v0  ;;  %v365_v1 = vld [vmem:[%s886_s4] sm:$0xf]  ;;  %s682_s11 = sshll.u32 %s892_s28, 3  ;;  %s714_s15 = sshll.u32 %s892_s28, 6  ;;  %v358_v9 = vld [vmem:[%s884_s2 + $0x8] sm:$0xff]  ;;  %v359_v12 = vld [vmem:[%s884_s2 + $0x10] sm:$0xff] }
   0xd   : > { %715 = vmatpush.msk.msra.mxu1 %vm333_vm0, %v365_v1  ;;  %s310_s14 = scalar_lea.vmem %s882_s0, %s682_s11  ;;  %s315_s18 = scalar_lea.vmem %s883_s1, %s714_s15  ;;  %v357_v8 = vld [vmem:[%s884_s2] sm:$0xff]  ;;  %v360_v14 = vld [vmem:[%s884_s2 + $0x18] sm:$0xff]  ;;  %v362_v17 = vld [vmem:[%s884_s2 + $0x28] sm:$0xff]  ;;  %vm528_vm3 = vcmask 261120   ;;  %vm594_vm4 = vcmask 15360   ;;  %vm616_vm5 = vcmask 8192  }
   0xe   : > { %687 = vmatpush.msk.msrb.mxu0 %vm333_vm0, %v365_v1  ;;  %v319_v2 = vld [vmem:[%s310_s14] sm:$0xff]  ;;  %v321_v4 = vld [vmem:[%s315_s18 + $0x8] sm:$0xff]  ;;  %v322_v5 = vld [vmem:[%s315_s18 + $0x10] sm:$0xff]  ;;  %s318_s9 = scalar_lea.vmem %s890_s8, %s892_s28 }
   0xf   : > { %686 = vmatmul.msk.f32.vlgmr.msra.gmra.mxu0 %vm329_vm1, %v319_v2  ;;  %v320_v3 = vld [vmem:[%s315_s18] sm:$0xff]  ;;  %689 = vmatmul.msk.f32.vlgmr.msra.gmra.mxu1 %vm329_vm1, %v321_v4  ;;  %v323_v6 = vld [vmem:[%s315_s18 + $0x18] sm:$0xff]  ;;  %v325_v11 = vld [vmem:[%s315_s18 + $0x28] sm:$0xff] }
  0x10   : > { %v324_v7 = vld [vmem:[%s315_s18 + $0x20] sm:$0xff]  ;;  %v326_v13 = vld [vmem:[%s315_s18 + $0x30] sm:$0xff]  ;;  %v327_v15 = vld [vmem:[%s315_s18 + $0x38] sm:$0xff] }
  0x11   : > { %v361_v16 = vld [vmem:[%s884_s2 + $0x20] sm:$0xff]  ;;  %v363_v18 = vld [vmem:[%s884_s2 + $0x30] sm:$0xff]  ;;  %v364_v19 = vld [vmem:[%s884_s2 + $0x38] sm:$0xff] }
  0x12   : > { %v523_v20 = vld [vmem:[%s888_s6 + $0x18] sm:$0xff]  ;;  %v522_v21 = vld [vmem:[%s888_s6 + $0x10] sm:$0xff]  ;;  %v521_v22 = vld [vmem:[%s888_s6 + $0x8] sm:$0xff] }
  0x13   : > { %717 = vmatpush.msra.mxu3 %v523_v20  ;;  %v520_v23 = vld [vmem:[%s888_s6] sm:$0xff] }
  0x14   : > { %v729_v26 = vld [vmem:[%s887_s5] ss:$0 sm:$0xff] }
  0x15   : > { %718 = vmatpush.msra.mxu3 %v522_v21 }
  0x17   : > { %688 = vmatmul.msk.f32.vlgmr.msrb.gmra.mxu0 %vm329_vm1, %v320_v3  ;;  %690 = vmatmul.msk.f32.gmra.mxu1 %vm329_vm1, %v322_v5 }
  0x18   : > { %719 = vmatpush.msra.mxu3 %v521_v22 }
  0x1a   : > { %720 = vmatpush.msra.mxu3 %v520_v23 }
  0x1f   : > { %691 = vmatmul.msk.f32.gmra.mxu1 %vm329_vm1, %v323_v6 }
  0x27   : > { %692 = vmatmul.msk.f32.gmra.mxu1 %vm329_vm1, %v324_v7  ;;  %v730_v7 = vld [vmem:[%s889_s7] ss:$0 sm:$0xff] }
  0x2f   : > { %693 = vmatmul.msk.f32.gmra.mxu1 %vm329_vm1, %v325_v11 }
  0x37   : > { %694 = vmatmul.msk.f32.gmra.mxu1 %vm329_vm1, %v326_v13 }
  0x3f   : > { %695 = vmatmul.msk.f32.gmra.mxu1 %vm329_vm1, %v327_v15 }
  0x8c   : > { %v354_v10 = vpop.f32.mrf.mxu0  ;;  %v413_v25 = vpop.f32.mrf.mxu1 }
  0x8d   : > { %474 = vmatpush.msra.mxu0 %v354_v10  ;;  %716 = vmatpush.msra.mxu2 %v354_v10 }
  0x8e   : > { %696 = vmatmul.msk.f32.vlgmr.msra.gmra.mxu0 %vm434_vm2, %v357_v8  ;;  %697 = vmatmul.msk.f32.vlgmr.msra.gmra.mxu2 %vm434_vm2, %v358_v9 }
  0x8f   : > { %565 = vmatpush.msrb.mxu0 %v523_v20 }
  0x91   : > { %566 = vmatpush.msrb.mxu0 %v522_v21 }
  0x93   : > { %567 = vmatpush.msrb.mxu0 %v521_v22 }
  0x94   : > { %v410_v24 = vpop.f32.mrf.mxu0  ;;  %v416_v29 = vpop.f32.mrf.mxu1 }
  0x95   : > { %568 = vmatpush.msrb.mxu0 %v520_v23 }
  0x96   : > { %698 = vmatmul.msk.f32.gmra.mxu2 %vm434_vm2, %v359_v12 }
  0x9c   : > { %v419_v35 = vpop.f32.mrf.mxu1 }
  0x9e   : > { %699 = vmatmul.msk.f32.gmra.mxu2 %vm434_vm2, %v360_v14 }
  0xa4   : > { %v422_v42 = vpop.f32.mrf.mxu1 }
  0xa6   : > { %700 = vmatmul.msk.f32.gmra.mxu2 %vm434_vm2, %v361_v16 }
  0xac   : > { %v425_v48 = vpop.f32.mrf.mxu1 }
  0xae   : > { %701 = vmatmul.msk.f32.gmra.mxu2 %vm434_vm2, %v362_v17 }
  0xb4   : > { %v428_v54 = vpop.f32.mrf.mxu1 }
  0xb6   : > { %702 = vmatmul.msk.f32.gmra.mxu2 %vm434_vm2, %v363_v18 }
  0xbc   : > { %v431_v60 = vpop.f32.mrf.mxu1 }
  0xbe   : > { %703 = vmatmul.msk.f32.gmra.mxu2 %vm434_vm2, %v364_v19 }
 0x10b   : > { %v476_v27 = vpop.f32.mrf.mxu0 }
 0x10c   : > { %v477_v28 = vadd.f32 %v476_v27, %v410_v24 }
 0x10e   : > { %v504_v30 = vadd.f32 %v729_v26, %v477_v28 }
 0x110   : > { %v512_v31 = vmax.f32 %v504_v30, 0.0 }
 0x111   : > { %v479_v32 = vpop.f32.mrf.mxu2 }
 0x112   : > { %v480_v33 = vadd.f32 %v479_v32, %v413_v25  ;;  %704 = vmatmul.msk.f32.vlgmr.msrb.gmra.mxu0 %vm528_vm3, %v512_v31 }
 0x114   : > { %v505_v34 = vadd.f32 %v729_v26, %v480_v33 }
 0x116   : > { %v513_v36 = vmax.f32 %v505_v34, 0.0 }
 0x119   : > { %v482_v37 = vpop.f32.mrf.mxu2 }
 0x11a   : > { %v483_v38 = vadd.f32 %v482_v37, %v416_v29  ;;  %705 = vmatmul.msk.f32.gmra.mxu0 %vm528_vm3, %v513_v36 }
 0x11c   : > { %v506_v39 = vadd.f32 %v729_v26, %v483_v38 }
 0x11e   : > { %v514_v40 = vmax.f32 %v506_v39, 0.0 }
 0x120   : > { %706 = vmatmul.msk.f32.vlgmr.msra.gmra.mxu3 %vm528_vm3, %v514_v40 }
 0x121   : > { %v485_v41 = vpop.f32.mrf.mxu2 }
 0x122   : > { %v486_v43 = vadd.f32 %v485_v41, %v419_v35 }
 0x124   : > { %v507_v44 = vadd.f32 %v729_v26, %v486_v43 }
 0x126   : > { %v515_v45 = vmax.f32 %v507_v44, 0.0 }
 0x128   : > { %707 = vmatmul.msk.f32.gmra.mxu3 %vm528_vm3, %v515_v45 }
 0x129   : > { %v488_v46 = vpop.f32.mrf.mxu2 }
 0x12a   : > { %v489_v47 = vadd.f32 %v488_v46, %v422_v42 }
 0x12c   : > { %v508_v49 = vadd.f32 %v729_v26, %v489_v47 }
 0x12e   : > { %v516_v50 = vmax.f32 %v508_v49, 0.0 }
 0x130   : > { %708 = vmatmul.msk.f32.gmra.mxu3 %vm528_vm3, %v516_v50 }
 0x131   : > { %v491_v51 = vpop.f32.mrf.mxu2 }
 0x132   : > { %v492_v52 = vadd.f32 %v491_v51, %v425_v48 }
 0x134   : > { %v509_v53 = vadd.f32 %v729_v26, %v492_v52 }
 0x136   : > { %v517_v55 = vmax.f32 %v509_v53, 0.0 }
 0x138   : > { %709 = vmatmul.msk.f32.gmra.mxu3 %vm528_vm3, %v517_v55 }
 0x139   : > { %v494_v56 = vpop.f32.mrf.mxu2 }
 0x13a   : > { %v495_v57 = vadd.f32 %v494_v56, %v428_v54 }
 0x13c   : > { %v510_v58 = vadd.f32 %v729_v26, %v495_v57 }
 0x13e   : > { %v518_v59 = vmax.f32 %v510_v58, 0.0 }
 0x140   : > { %710 = vmatmul.msk.f32.gmra.mxu3 %vm528_vm3, %v518_v59 }
 0x141   : > { %v497_v61 = vpop.f32.mrf.mxu2 }
 0x142   : > { %v498_v62 = vadd.f32 %v497_v61, %v431_v60 }
 0x144   : > { %v511_v63 = vadd.f32 %v729_v26, %v498_v62 }
 0x146   : > { %v519_v0 = vmax.f32 %v511_v63, 0.0 }
 0x148   : > { %711 = vmatmul.msk.f32.gmra.mxu3 %vm528_vm3, %v519_v0 }
 0x18f   : > { %v570_v4 = vpop.f32.mrf.mxu0 }
 0x190   : > { %v571_v10 = vadd.f32 %v730_v7, %v570_v4 }
 0x192   : > { %v595_v17 = vsel %vm594_vm4, %v571_v10, -inf }
 0x197   : > { %v573_v8 = vpop.f32.mrf.mxu0 }
 0x198   : > { %v574_v11 = vadd.f32 %v730_v7, %v573_v8 }
 0x19a   : > { %v596_v19 = vsel %vm594_vm4, %v574_v11, -inf }
 0x1a3   : > { %v576_v1 = vpop.f32.mrf.mxu3 }
 0x1a4   : > { %v577_v14 = vadd.f32 %v730_v7, %v576_v1 }
 0x1a6   : > { %v597_v24 = vsel %vm594_vm4, %v577_v14, -inf }
 0x1ab   : > { %v579_v2 = vpop.f32.mrf.mxu3 }
 0x1ac   : > { %v580_v15 = vadd.f32 %v730_v7, %v579_v2 }
 0x1ae   : > { %v598_v25 = vsel %vm594_vm4, %v580_v15, -inf }
 0x1b3   : > { %v582_v3 = vpop.f32.mrf.mxu3 }
 0x1b4   : > { %v583_v12 = vadd.f32 %v730_v7, %v582_v3 }
 0x1b6   : > { %v599_v20 = vsel %vm594_vm4, %v583_v12, -inf }
 0x1b7   : > { %v600_v27 = vmax.f32 %v595_v17, %v599_v20 }
 0x1bb   : > { %v585_v5 = vpop.f32.mrf.mxu3 }
 0x1bc   : > { %v586_v9 = vadd.f32 %v730_v7, %v585_v5 }
 0x1be   : > { %v601_v16 = vsel %vm594_vm4, %v586_v9, -inf }
 0x1bf   : > { %v602_v23 = vmax.f32 %v596_v19, %v601_v16 }
 0x1c1   : > { %v607_v30 = vmax.f32 %v600_v27, %v602_v23 }
 0x1c3   : > { %v588_v6 = vpop.f32.mrf.mxu3 }
 0x1c4   : > { %v589_v13 = vadd.f32 %v730_v7, %v588_v6 }
 0x1c6   : > { %v603_v21 = vsel %vm594_vm4, %v589_v13, -inf }
 0x1c7   : > { %v604_v28 = vmax.f32 %v597_v24, %v603_v21 }
 0x1cb   : > { %v591_v18 = vpop.f32.mrf.mxu3 }
 0x1cc   : > { %v592_v22 = vadd.f32 %v730_v7, %v591_v18 }
 0x1ce   : > { %v605_v26 = vsel %vm594_vm4, %v592_v22, -inf }
 0x1cf   : > { %v606_v29 = vmax.f32 %v598_v25, %v605_v26 }
 0x1d1   : > { %v608_v31 = vmax.f32 %v604_v28, %v606_v29 }
 0x1d3   : > { %v609_v32 = vmax.f32 %v607_v30, %v608_v31 }
 0x1d5   : > { %v610_v33 = vrot.slane %v609_v32, 4 }
 0x1d7   : > { %v611_v34 = vmax.f32 %v609_v32, %v610_v33 }
 0x1d9   : > { %v612_v35 = vrot.slane %v611_v34, 2 }
 0x1db   : > { %v613_v36 = vmax.f32 %v611_v34, %v612_v35 }
 0x1dd   : > { %v614_v37 = vrot.slane %v613_v36, 1 }
 0x1df   : > { %v615_v38 = vmax.f32 %v613_v36, %v614_v37 }
 0x1e1   : > { %617 = vst.msk [vmem:[%s318_s9] sm:$0x1] %vm616_vm5, %v615_v38 }
 0x1e2 PF: > { %s18_s27 = sadd.s32 1, %s737_s27  }
 0x1e3   : > { %p15_p4 = scmp.ge.s32.totalorder %s18_s27, 4  }
 0x1e5   :  { %17 = sbr.rel (!%p15_p4) target bundleno = 1 (0x1), region = 85 }

// kernel: planner_forward.7
= control target key start
LH: loop header
LB: loop body
LE: loop exit
PB: predicated region body
PF: predicated region fallthrough
CT: control target
= control target key end

     0   :  { %vm41_vm0 = vcmask 1046528   ;;  %s181_s0 = inlined_call_operand.vmem [shape: f32[2,7], index: 0, kind: input, shape index: {}]   ;;  %s182_s1 = inlined_call_operand.vmem [shape: f32[7,8], index: 1, kind: input, shape index: {}]   ;;  %s183_s2 = inlined_call_operand.vmem [shape: f32[7,8], index: 2, kind: input, shape index: {}]   ;;  %s184_s3 = inlined_call_operand.hbm [shape: f32[2,8], index: 3, kind: output, shape index: {}]  }
   0x1   :  { %v36_v0 = vld [vmem:[%s183_s2] sm:$0x7f] }
   0x2   :  { %v26_v1 = vld [vmem:[%s182_s1] sm:$0x7f]  ;;  %109 = vmatpush.msk.msra.mxu0 %vm41_vm0, %v36_v0 }
   0x3   :  { %111 = vmatpush.msk.msra.mxu1 %vm41_vm0, %v26_v1  ;;  %v15_v2 = vld [vmem:[%s181_s0] sm:$0x3] }
   0x4   :  { %8 = vsyncpa [#allocation3], 0  ;;  %v28_v3 = vand.u32 2147483647, %v15_v2  ;;  %v16_v4 = vsub.f32 0.0, %v15_v2  ;;  %v27_v14 = vmin.f32 %v15_v2, 0.0 }
   0x5   :  { %vm37_vm1 = vcmask 56320   ;;  %s148_s0 = smov [#allocation2]   ;;  %s100_s19 = sshll.u32 %s184_s3, 4  ;;  %vm91_vm2 = vcmask 58368   ;;  %s101_s19 = int_to_ptr.hbm [resolvable:$true] %s100_s19 }
   0x6   :  { %v29_v5 = vsub.f32 0.0, %v28_v3  ;;  %v18_v6 = vand.u32 2147483647, %v16_v4  ;;  %v17_v17 = vmin.f32 %v16_v4, 0.0  ;;  %s98_s1 = sshll.u32 %s148_s0, 4  ;;  %s99_s1 = int_to_ptr.vmem [resolvable:$true] %s98_s1 }
   0x8   :  { %v30_v7 = vmul.f32 1.442695, %v29_v5  ;;  %v19_v8 = vsub.f32 0.0, %v18_v6 }
   0xa   :  { %114 = vpow2.f32 %v30_v7  ;;  %v20_v9 = vmul.f32 1.442695, %v19_v8 }
   0xc   :  { %116 = vpow2.f32 %v20_v9 }
  0x10   :  { %v115_v10 = vpop.eup %114 }
  0x11   :  { %v32_v11 = vadd.f32 1.0, %v115_v10 }
  0x12   :  { %v117_v12 = vpop.eup %116 }
  0x13   :  { %118 = vlog2.f32 %v32_v11  ;;  %v22_v13 = vadd.f32 1.0, %v117_v12 }
  0x15   :  { %120 = vlog2.f32 %v22_v13 }
  0x19   :  { %v119_v15 = vpop.eup %118 }
  0x1a   :  { %v34_v16 = vmul.f32 0.6931472, %v119_v15 }
  0x1b   :  { %v121_v18 = vpop.eup %120 }
  0x1c   :  { %v35_v19 = vsub.f32 %v27_v14, %v34_v16  ;;  %v24_v20 = vmul.f32 0.6931472, %v121_v18 }
  0x1e   :  { %110 = vmatmul.msk.f32.vlgmr.msra.gmra.mxu0 %vm37_vm1, %v35_v19  ;;  %v25_v21 = vsub.f32 %v17_v17, %v24_v20 }
  0x20   :  { %112 = vmatmul.msk.f32.vlgmr.msra.gmra.mxu1 %vm37_vm1, %v25_v21 }
  0x9b   :  { %v62_v22 = vpop.f32.mrf.mxu0 }
  0x9d   :  { %v88_v23 = vpop.f32.mrf.mxu1 }
  0x9e   :  { %v89_v24 = vadd.f32 %v88_v23, %v62_v22 }
  0xa0   :  { %92 = vst.msk [vmem:[#allocation2] sm:$0x3] %vm91_vm2, %v89_v24 }
  0xa1   :  { %103 = dma.vmem_to_hbm [thread:$0]  %s99_s1, 32, %s101_s19, [#allocation3]  }
  0xa2   :  { %146 = dma.done.wait [#allocation3], 32  }
  0xa3   :  { %147 = vsyncadd [#allocation3], 4294967264 }
  0xa4   :  { %108 = vsyncpa [#allocation3], 1 }

// kernel: planner_forward.5
= control target key start
LH: loop header
LB: loop body
LE: loop exit
PB: predicated region body
PF: predicated region fallthrough
CT: control target
= control target key end

     0   :  { %s893_s13 = smov 0   ;;  %s1064_s0 = inlined_call_operand.vmem [shape: f32[2,1,4], index: 0, kind: input, shape index: {}]   ;;  %s1065_s1 = inlined_call_operand.vmem [shape: f32[2,8,4], index: 1, kind: input, shape index: {}]   ;;  %s1066_s2 = inlined_call_operand.vmem [shape: f32[2,8,8,4], index: 2, kind: input, shape index: {}]   ;;  %s1067_s3 = inlined_call_operand.vmem [shape: f32[4,32], index: 3, kind: input, shape index: {}]   ;;  %s1068_s4 = inlined_call_operand.vmem [shape: f32[4,32], index: 4, kind: input, shape index: {}]   ;;  %s1069_s5 = inlined_call_operand.vmem [shape: f32[4,32], index: 5, kind: input, shape index: {}]   ;;  %s1070_s6 = inlined_call_operand.vmem [shape: f32[4,32], index: 6, kind: input, shape index: {}]   ;;  %s1071_s7 = inlined_call_operand.vmem [shape: f32[1,32], index: 7, kind: input, shape index: {}]   ;;  %s1072_s8 = inlined_call_operand.vmem [shape: f32[32,3], index: 8, kind: input, shape index: {}]   ;;  %s1073_s9 = inlined_call_operand.vmem [shape: f32[1,3], index: 9, kind: input, shape index: {}]   ;;  %s1074_s10 = inlined_call_operand.vmem [shape: f32[2,1,3], index: 10, kind: output, shape index: {}]  }
   0x1 LB: > { %s800_s14 = sadd.s32 4294967295, %s836_s13   ;;  %p804_p0 = scmp.ge.s32.totalorder %s836_s13, 1  ;;  %s836_s13 = sphi %s893_s13, %s20_s13  }
   0x2   : > { %p329_p1 = scmp.lt.s32.totalorder %s836_s13, 3 }
   0x4   : > { %p330_p2 = pnand %p804_p0, %p329_p1 }
   0x5   : > { %p372_p3 = scmp.lt.s32.totalorder (!%p330_p2), %s800_s14, 1 }
   0x6   : > { %333 = sbr.rel (%p330_p2) target bundleno = 337 (0x151), region = 60 }
   0xb   : > { %vm540_vm0 = vcmask 1043456   ;;  %v593_v0 = vld [vmem:[%s1069_s5] sm:$0xf]  ;;  %v397_v1 = vlaneseq  ;;  %s1078_s14 = smov (!%p372_p3, %s800_s14), 1  ;;  %vm415_vm7 = vcmask 31744   ;;  %vm602_vm10 = vcmask 1041409  }
   0xc   : > { %812 = vmatpush.msk.msra.mxu2 %vm540_vm0, %v593_v0  ;;  %v536_v2 = vld [vmem:[%s1067_s3] sm:$0xf]  ;;  %s819_s21 = sshll.u32 %s1078_s14, 6  ;;  %s374_s24 = scalar_lea.vmem %s1064_s0, %s1078_s14  ;;  %vm604_vm11 = vcmask 1042434   ;;  %vm606_vm12 = vcmask 1043459   ;;  %vm608_vm13 = vcmask 1044484  }
   0xd   : > { %v910_v3 = vshrl.u32 %v397_v1, 7  ;;  %808 = vmatpush.msk.msra.mxu0 %vm540_vm0, %v536_v2  ;;  %v642_v4 = vld [vmem:[%s1070_s6] sm:$0xf]  ;;  %s383_s27 = scalar_lea.vmem %s1066_s2, %s819_s21  ;;  %s805_s28 = sshll.u32 %s1078_s14, 3  ;;  %vm610_vm14 = vcmask 1045509   ;;  %vm612_vm15 = vcmask 1046534  }
   0xe   : > { %814 = vmatpush.msk.msra.mxu3 %vm540_vm0, %v642_v4  ;;  %v387_v5 = vld [vmem:[%s374_s24] sm:$0x1]  ;;  %v933_v7 = vld [vmem:[%s383_s27 + $0x8] sm:$0xff]  ;;  %v935_v8 = vld [vmem:[%s383_s27 + $0x10] sm:$0xff]  ;;  %s378_s11 = scalar_lea.vmem %s1065_s1, %s805_s28  ;;  %s386_s30 = scalar_lea.vmem %s1074_s10, %s1078_s14 }
   0xf   : > { %vm399_vm1 = vcmp.ne.s32.totalorder %v910_v3, 0  ;;  %vm400_vm2 = vcmp.ne.s32.totalorder %v910_v3, 1  ;;  %vm401_vm3 = vcmp.ne.s32.totalorder %v910_v3, 2  ;;  %vm402_vm4 = vcmp.ne.s32.totalorder %v910_v3, 3  ;;  %v931_v6 = vld [vmem:[%s383_s27] sm:$0xff]  ;;  %809 = vmatmul.msk.f32.vlgmr.msra.gmra.mxu0 %vm415_vm7, %v387_v5  ;;  %v940_v9 = vld [vmem:[%s383_s27 + $0x18] sm:$0xff] }
  0x10   : > { %vm403_vm5 = vcmp.ne.s32.totalorder %v910_v3, 4  ;;  %vm404_vm6 = vcmp.ne.s32.totalorder %v910_v3, 5  ;;  %vm405_vm8 = vcmp.ne.s32.totalorder %v910_v3, 6  ;;  %vm1075_vm9 = vcmp.ne.s32.totalorder %v910_v3, 7  ;;  %v942_v10 = vld [vmem:[%s383_s27 + $0x20] sm:$0xff]  ;;  %v944_v11 = vld [vmem:[%s383_s27 + $0x28] sm:$0xff] }
  0x11   : > { %v407_v12 = vsel %vm399_vm1, %v931_v6, 0.0  ;;  %v408_v13 = vsel %vm400_vm2, %v933_v7, 0.0  ;;  %v409_v14 = vsel %vm401_vm3, %v935_v8, 0.0  ;;  %v955_v15 = vld [vmem:[%s383_s27 + $0x30] sm:$0xff]  ;;  %v957_v16 = vld [vmem:[%s383_s27 + $0x38] sm:$0xff]  ;;  %v410_v17 = vsel %vm402_vm4, %v940_v9, 0.0 }
  0x12   : > { %v411_v18 = vsel %vm403_vm5, %v942_v10, 0.0  ;;  %v412_v19 = vsel %vm404_vm6, %v944_v11, 0.0  ;;  %v416_v20 = vsel %vm415_vm7, %v407_v12, -inf  ;;  %v413_v21 = vsel %vm405_vm8, %v955_v15, 0.0  ;;  %v564_v49 = vld [vmem:[%s1068_s4] sm:$0xf] }
  0x13   : > { %v414_v22 = vsel %vm1075_vm9, %v957_v16, 0.0  ;;  %v417_v23 = vrot.slane %v416_v20, 4  ;;  %v423_v24 = vsel %vm415_vm7, %v408_v13, -inf  ;;  %v430_v26 = vsel %vm415_vm7, %v409_v14, -inf  ;;  %v388_v50 = vld [vmem:[%s378_s11] sm:$0xff]  ;;  %810 = vmatpush.msk.msra.mxu1 %vm540_vm0, %v564_v49 }
  0x14   : > { %v424_v25 = vrot.slane %v423_v24, 4  ;;  %v437_v27 = vsel %vm415_vm7, %v410_v17, -inf  ;;  %v444_v28 = vsel %vm415_vm7, %v411_v18, -inf  ;;  %v431_v30 = vrot.slane %v430_v26, 4  ;;  %811 = vmatmul.msk.f32.vlgmr.msra.gmra.mxu1 %vm415_vm7, %v388_v50 }
  0x15   : > { %v418_v29 = vmax.f32 %v416_v20, %v417_v23  ;;  %v438_v31 = vrot.slane %v437_v27, 4  ;;  %v445_v32 = vrot.slane %v444_v28, 4  ;;  %v451_v34 = vsel %vm415_vm7, %v412_v19, -inf }
  0x16   : > { %v425_v33 = vmax.f32 %v423_v24, %v424_v25  ;;  %v458_v35 = vsel %vm415_vm7, %v413_v21, -inf  ;;  %v465_v36 = vsel %vm415_vm7, %v414_v22, -inf  ;;  %v432_v38 = vmax.f32 %v430_v26, %v431_v30 }
  0x17   : > { %v419_v37 = vrot.slane %v418_v29, 2  ;;  %v439_v39 = vmax.f32 %v437_v27, %v438_v31  ;;  %v446_v40 = vmax.f32 %v444_v28, %v445_v32  ;;  %v452_v42 = vrot.slane %v451_v34, 4 }
  0x18   : > { %v426_v41 = vrot.slane %v425_v33, 2  ;;  %v459_v43 = vrot.slane %v458_v35, 4  ;;  %v466_v44 = vrot.slane %v465_v36, 4  ;;  %v433_v46 = vrot.slane %v432_v38, 2 }
  0x19   : > { %v420_v45 = vmax.f32 %v418_v29, %v419_v37  ;;  %v440_v47 = vrot.slane %v439_v39, 2  ;;  %v447_v48 = vrot.slane %v446_v40, 2  ;;  %v453_v52 = vmax.f32 %v451_v34, %v452_v42 }
  0x1a   : > { %v427_v51 = vmax.f32 %v425_v33, %v426_v41  ;;  %v460_v53 = vmax.f32 %v458_v35, %v459_v43  ;;  %v467_v54 = vmax.f32 %v465_v36, %v466_v44  ;;  %v434_v56 = vmax.f32 %v432_v38, %v433_v46 }
  0x1b   : > { %v421_v55 = vrot.slane %v420_v45, 1  ;;  %v441_v57 = vmax.f32 %v439_v39, %v440_v47  ;;  %v448_v58 = vmax.f32 %v446_v40, %v447_v48  ;;  %vm614_vm9 = vcmask 1047559  }
  0x1c   : > { %v428_v59 = vrot.slane %v427_v51, 1  ;;  %v454_v60 = vrot.slane %v453_v52, 2  ;;  %v461_v61 = vrot.slane %v460_v53, 2  ;;  %v468_v62 = vrot.slane %v467_v54, 2 }
  0x1d   : > { %v422_v63 = vmax.f32 %v420_v45, %v421_v55  ;;  %v435_v0 = vrot.slane %v434_v56, 1  ;;  %v442_v1 = vrot.slane %v441_v57, 1  ;;  %v449_v2 = vrot.slane %v448_v58, 1 }
  0x1e   : > { %v429_v4 = vmax.f32 %v427_v51, %v428_v59  ;;  %v455_v5 = vmax.f32 %v453_v52, %v454_v60  ;;  %v462_v12 = vmax.f32 %v460_v53, %v461_v61  ;;  %v469_v13 = vmax.f32 %v467_v54, %v468_v62 }
  0x1f   : > { %v436_v14 = vmax.f32 %v434_v56, %v435_v0  ;;  %v443_v17 = vmax.f32 %v441_v57, %v442_v1  ;;  %v450_v18 = vmax.f32 %v448_v58, %v449_v2  ;;  %v472_v19 = vsel %vm399_vm1, %v931_v6, 1.0 }
  0x20   : > { %v456_v20 = vrot.slane %v455_v5, 1  ;;  %v463_v21 = vrot.slane %v462_v12, 1  ;;  %v470_v22 = vrot.slane %v469_v13, 1  ;;  %v603_v23 = vsel %vm602_vm10, %v429_v4, %v422_v63 }
  0x21   : > { %v605_v24 = vsel %vm604_vm11, %v436_v14, %v603_v23  ;;  %v473_v25 = vsel %vm400_vm2, %v933_v7, 1.0  ;;  %v474_v26 = vsel %vm401_vm3, %v935_v8, 1.0  ;;  %v475_v27 = vsel %vm402_vm4, %v940_v9, 1.0 }
  0x22   : > { %v457_v6 = vmax.f32 %v455_v5, %v456_v20  ;;  %v464_v28 = vmax.f32 %v462_v12, %v463_v21  ;;  %v471_v29 = vmax.f32 %v469_v13, %v470_v22  ;;  %v607_v30 = vsel %vm606_vm12, %v443_v17, %v605_v24 }
  0x23   : > { %v609_v31 = vsel %vm608_vm13, %v450_v18, %v607_v30  ;;  %v476_v32 = vsel %vm403_vm5, %v942_v10, 1.0  ;;  %v477_v7 = vsel %vm404_vm6, %v944_v11, 1.0  ;;  %v478_v8 = vsel %vm405_vm8, %v955_v15, 1.0 }
  0x24   : > { %v611_v9 = vsel %vm610_vm14, %v457_v6, %v609_v31  ;;  %vm1076_vm0 = vcmp.ne.s32.totalorder %v910_v3, 7  ;;  %v480_v34 = vsel %vm415_vm7, %v472_v19, inf  ;;  %v487_v35 = vsel %vm415_vm7, %v473_v25, inf }
  0x25   : > { %v479_v33 = vsel %vm1076_vm0, %v957_v16, 1.0  ;;  %v613_v10 = vsel %vm612_vm15, %v464_v28, %v611_v9  ;;  %v481_v36 = vrot.slane %v480_v34, 4  ;;  %v488_v37 = vrot.slane %v487_v35, 4 }
  0x26   : > { %v494_v11 = vsel %vm415_vm7, %v474_v26, inf  ;;  %v615_v38 = vsel %vm614_vm9, %v471_v29, %v613_v10  ;;  %v501_v15 = vsel %vm415_vm7, %v475_v27, inf  ;;  %v508_v40 = vsel %vm415_vm7, %v476_v32, inf  ;;  %v692_v10 = vld [vmem:[%s1072_s8 + $0x10] sm:$0xff] }
  0x27   : > { %v495_v39 = vrot.slane %v494_v11, 4  ;;  %813 = vmatmul.msk.f32.vlgmr.msra.gmra.mxu2 %vm415_vm7, %v615_v38  ;;  %v482_v3 = vmin.f32 %v480_v34, %v481_v36  ;;  %v489_v16 = vmin.f32 %v487_v35, %v488_v37  ;;  %v502_v41 = vrot.slane %v501_v15, 4  ;;  %v693_v35 = vld [vmem:[%s1072_s8 + $0x18] sm:$0xff]  ;;  %v691_v36 = vld [vmem:[%s1072_s8 + $0x8] sm:$0xff]  ;;  %v690_v37 = vld [vmem:[%s1072_s8] sm:$0xff] }
  0x28   : > { %v509_v42 = vrot.slane %v508_v40, 4  ;;  %v515_v44 = vsel %vm415_vm7, %v477_v7, inf  ;;  %v522_v45 = vsel %vm415_vm7, %v478_v8, inf  ;;  %v529_v46 = vsel %vm415_vm7, %v479_v33, inf  ;;  %714 = vmatpush.msrb.mxu0 %v693_v35 }
  0x29   : > { %v496_v43 = vmin.f32 %v494_v11, %v495_v39  ;;  %v483_v47 = vrot.slane %v482_v3, 2  ;;  %v490_v48 = vrot.slane %v489_v16, 2  ;;  %v503_v49 = vmin.f32 %v501_v15, %v502_v41 }
  0x2a   : > { %v510_v50 = vmin.f32 %v508_v40, %v509_v42  ;;  %v516_v52 = vrot.slane %v515_v44, 4  ;;  %v523_v53 = vrot.slane %v522_v45, 4  ;;  %v530_v54 = vrot.slane %v529_v46, 4  ;;  %715 = vmatpush.msrb.mxu0 %v692_v10 }
  0x2b   : > { %v497_v51 = vrot.slane %v496_v43, 2  ;;  %v484_v55 = vmin.f32 %v482_v3, %v483_v47  ;;  %v491_v56 = vmin.f32 %v489_v16, %v490_v48  ;;  %v504_v57 = vrot.slane %v503_v49, 2  ;;  %v828_v16 = vld [vmem:[%s1071_s7] ss:$0 sm:$0xff] }
  0x2c   : > { %v511_v58 = vrot.slane %v510_v50, 2  ;;  %v517_v60 = vmin.f32 %v515_v44, %v516_v52  ;;  %v524_v61 = vmin.f32 %v522_v45, %v523_v53  ;;  %v531_v62 = vmin.f32 %v529_v46, %v530_v54  ;;  %716 = vmatpush.msrb.mxu0 %v691_v36  ;;  %v829_v45 = vld [vmem:[%s1073_s9] ss:$0 sm:$0xff] }
  0x2d   : > { %v498_v59 = vmin.f32 %v496_v43, %v497_v51  ;;  %v485_v63 = vrot.slane %v484_v55, 1  ;;  %v492_v0 = vrot.slane %v491_v56, 1  ;;  %v505_v1 = vmin.f32 %v503_v49, %v504_v57 }
  0x2e   : > { %v512_v2 = vmin.f32 %v510_v50, %v511_v58  ;;  %v518_v5 = vrot.slane %v517_v60, 2  ;;  %v525_v12 = vrot.slane %v524_v61, 2  ;;  %v532_v13 = vrot.slane %v531_v62, 2  ;;  %717 = vmatpush.msrb.mxu0 %v690_v37 }
  0x2f   : > { %v499_v4 = vrot.slane %v498_v59, 1  ;;  %v486_v14 = vmin.f32 %v484_v55, %v485_v63  ;;  %v493_v17 = vmin.f32 %v491_v56, %v492_v0  ;;  %v506_v18 = vrot.slane %v505_v1, 1 }
  0x30   : > { %v513_v19 = vrot.slane %v512_v2, 1  ;;  %v519_v21 = vmin.f32 %v517_v60, %v518_v5  ;;  %v526_v22 = vmin.f32 %v524_v61, %v525_v12  ;;  %v533_v23 = vmin.f32 %v531_v62, %v532_v13 }
  0x31   : > { %v500_v20 = vmin.f32 %v498_v59, %v499_v4  ;;  %v507_v24 = vmin.f32 %v505_v1, %v506_v18  ;;  %v651_v26 = vsel %vm602_vm10, %v493_v17, %v486_v14  ;;  %vm698_vm1 = vcmask 261120  }
  0x32   : > { %v514_v25 = vmin.f32 %v512_v2, %v513_v19  ;;  %v520_v27 = vrot.slane %v519_v21, 1  ;;  %v527_v6 = vrot.slane %v526_v22, 1  ;;  %v534_v28 = vrot.slane %v533_v23, 1 }
  0x33   : > { %v652_v29 = vsel %vm604_vm11, %v500_v20, %v651_v26  ;;  %vm722_vm2 = vcmask 23552   ;;  %vm730_vm3 = vcmask 16384  }
  0x34   : > { %v653_v30 = vsel %vm606_vm12, %v507_v24, %v652_v29  ;;  %v521_v31 = vmin.f32 %v519_v21, %v520_v27  ;;  %v528_v32 = vmin.f32 %v526_v22, %v527_v6  ;;  %v535_v7 = vmin.f32 %v533_v23, %v534_v28 }
  0x35   : > { %v654_v8 = vsel %vm608_vm13, %v514_v25, %v653_v30 }
  0x36   : > { %v655_v9 = vsel %vm610_vm14, %v521_v31, %v654_v8 }
  0x37   : > { %v656_v33 = vsel %vm612_vm15, %v528_v32, %v655_v9 }
  0x38   : > { %v657_v34 = vsel %vm614_vm9, %v535_v7, %v656_v33 }
  0x39   : > { %815 = vmatmul.msk.f32.vlgmr.msra.gmra.mxu3 %vm415_vm7, %v657_v34 }
  0x8c   : > { %v561_v11 = vpop.f32.mrf.mxu0 }
  0x8d   : > { %v591_v38 = vperm.slane %v561_v11, 0 }
  0x91   : > { %v588_v39 = vpop.f32.mrf.mxu1 }
  0x92   : > { %v592_v15 = vadd.f32 %v591_v38, %v588_v39 }
  0xaa   : > { %v638_v40 = vpop.f32.mrf.mxu2 }
  0xab   : > { %v641_v3 = vadd.f32 %v638_v40, %v592_v15 }
  0xbc   : > { %v680_v41 = vpop.f32.mrf.mxu3 }
  0xbd   : > { %v683_v42 = vadd.f32 %v680_v41, %v641_v3 }
  0xbf   : > { %v688_v43 = vadd.f32 %v828_v16, %v683_v42 }
  0xc1   : > { %v689_v44 = vmax.f32 %v688_v43, 0.0 }
  0xc3   : > { %816 = vmatmul.msk.f32.vlgmr.msrb.gmra.mxu0 %vm698_vm1, %v689_v44 }
 0x140   : > { %v719_v46 = vpop.f32.mrf.mxu0 }
 0x141   : > { %v720_v47 = vadd.f32 %v829_v45, %v719_v46 }
 0x143   : > { %v723_v48 = vsel %vm722_vm2, %v720_v47, -inf }
 0x144   : > { %v724_v49 = vrot.slane %v723_v48, 4 }
 0x146   : > { %v725_v50 = vmax.f32 %v723_v48, %v724_v49 }
 0x148   : > { %v726_v51 = vrot.slane %v725_v50, 2 }
 0x14a   : > { %v727_v52 = vmax.f32 %v725_v50, %v726_v51 }
 0x14c   : > { %v728_v53 = vrot.slane %v727_v52, 1 }
 0x14e   : > { %v729_v54 = vmax.f32 %v727_v52, %v728_v53 }
 0x150   : > { %731 = vst.msk [vmem:[%s386_s30] sm:$0x1] %vm730_vm3, %v729_v54 }
 0x151 PF: > { %s20_s13 = sadd.s32 1, %s836_s13  }
 0x152   : > { %p17_p4 = scmp.ge.s32.totalorder %s20_s13, 4  }
 0x154   :  { %19 = sbr.rel (!%p17_p4) target bundleno = 1 (0x1), region = 96 }

</bundles_post_ra>
